<compile_context>
chip_gen: v7x
topology: tpu7x:2x2x1
jax: 0.10.0
libtpu: 0.0.40
codegen_flags: <defaults>
</compile_context>

<pallas_src>
import functools

import jax
import jax.numpy as jnp
from jax import lax
from jax.experimental import pallas as pl
from jax.experimental.pallas import tpu as pltpu

_BIG = 1e4  # sigmoid(_BIG + anything reasonable) == 1.0 exactly in f32


def _round_up(x, m):
    return ((x + m - 1) // m) * m


def _gru_recurrence_kernel(*refs, hidden_pad, bias_lane, t_chunk, unroll):
    """One grid step == t_chunk timesteps. Hidden state carried in VMEM scratch.

    refs (bias folded into the matmul, bias_lane >= 0):
        gx_ref : (t_chunk, Bb, 3*Hp) bf16 -- x W_ih^T + fused biases (padded)
        whh_ref: (Hp, 3*Hp)          bf16 -- [W_hr | W_hz | W_hn]^T (+ b_hn row)
        h_out  : (Bb, Hp)            f32  -- final hidden state (last chunk)
        h_ref  : (Bb, Hp)            f32  -- VMEM scratch carrying h
    refs (fallback, bias_lane < 0): an extra (1, Hp) f32 b_hn ref before h_out.
    """
    if bias_lane >= 0:
        gx_ref, whh_ref, h_out_ref, h_ref = refs
        bhn = None
    else:
        gx_ref, whh_ref, bhn_ref, h_out_ref, h_ref = refs
        bhn = bhn_ref[...]                                   # (1, Hp) f32

    Hp = hidden_pad
    c = pl.program_id(1)                                     # time-chunk index

    @pl.when(c == 0)
    def _():
        # zeros, except the bias lane (if any) which carries a constant 1.0
        lane = lax.broadcasted_iota(jnp.int32, h_ref.shape, 1)
        h_ref[...] = jnp.where(lane == bias_lane, 1.0, 0.0).astype(h_ref.dtype)

    whh = whh_ref[...]                                       # (Hp, 3Hp) bf16

    def step(i, h):
        gx = gx_ref[i].astype(jnp.float32)                   # (Bb, 3Hp) f32
        # Single fused MXU call for all three gates (bf16 operands, f32 acc).
        gh = jnp.dot(h.astype(jnp.bfloat16), whh,
                     preferred_element_type=jnp.float32)     # (Bb, 3Hp)
        # Lane-aligned slices (offsets 0 / Hp / 2Hp are multiples of 128).
        r = jax.nn.sigmoid(gx[:, :Hp] + gh[:, :Hp])
        z = jax.nn.sigmoid(gx[:, Hp:2 * Hp] + gh[:, Hp:2 * Hp])
        ghn = gh[:, 2 * Hp:]
        if bias_lane < 0:                                    # static fallback
            ghn = ghn + bhn
        n = jnp.tanh(gx[:, 2 * Hp:] + r * ghn)
        return (1.0 - z) * n + z * h

    h = h_ref[...]
    if t_chunk <= 8:
        for i in range(t_chunk):                             # fully unrolled
            h = step(i, h)
    else:
        # partial unroll: keeps LLO scheduling visibility, bounds vreg pressure
        h = lax.fori_loop(0, t_chunk, step, h, unroll=unroll)
    h_ref[...] = h

    @pl.when(c == pl.num_programs(1) - 1)
    def _():
        h_out_ref[...] = h.astype(h_out_ref.dtype)


@jax.jit
def gru_forward(x, w_ih, w_hh, b_ih, b_hh, w_lin, b_lin):
    """x: (batch, seq, input_dim), PyTorch batch_first layout.

    w_ih: (3H, D), w_hh: (3H, H), b_ih/b_hh: (3H,)  -- PyTorch GRU param layout,
    gate order [r, z, n].  w_lin: (O, H), b_lin: (O,).  Returns (batch, O).
    """
    B, T, D = x.shape
    H = w_hh.shape[1]

    Hp = _round_up(H, 128)              # lane-aligned per-gate width
    fold_bias = Hp > H                  # spare lane available for the b_hn fold
    bias_lane = H if fold_bias else -1

    # ---- time chunking: pad T (exact no-op padded steps) instead of shrinking
    t_chunk = min(32, _round_up(T, 8))
    T_pad = _round_up(T, t_chunk)

    # ---- batch split across TensorCores (v7x megacore) when worthwhile -------
    b_block = B // 2 if (B >= 16 and B % 16 == 0) else B

    # ---- hoisted input projection (no sequential dependency) -----------------
    # Fuse r/z input+hidden biases and b_in here; b_hn is folded into W_hh (or
    # passed separately if H is a multiple of 128).
    bias_fused = jnp.concatenate([b_ih[:2 * H] + b_hh[:2 * H], b_ih[2 * H:]])
    gx_all = jnp.einsum("btd,gd->tbg", x, w_ih,
                        preferred_element_type=jnp.float32) + bias_fused
    # (T,B,3H) -> (T_pad,B,3,Hp) -> (T_pad,B,3*Hp): lane-aligned gate blocks.
    gx4 = gx_all.reshape(T, B, 3, H)
    gx4 = jnp.pad(gx4, ((0, T_pad - T), (0, 0), (0, 0), (0, Hp - H)))
    gx = gx4.reshape(T_pad, B, 3 * Hp)
    if T_pad > T:
        # padded timesteps: force z = 1  ->  h' = h exactly (no-op)
        gx = gx.at[T:, :, Hp:2 * Hp].set(_BIG)
    if fold_bias:
        # bias lane: force its z = 1 every step so h[:, H] stays exactly 1.0
        gx = gx.at[:, :, Hp + H].set(_BIG)
    gx = gx.astype(jnp.bfloat16)        # stream gx in bf16 (halves HBM bytes)

    # ---- recurrent weight: lane-aligned fused [r|z|n], bf16 for the MXU ------
    w_hr, w_hz, w_hn = w_hh[:H], w_hh[H:2 * H], w_hh[2 * H:]
    whh_p = jnp.zeros((Hp, 3 * Hp), jnp.float32)
    whh_p = whh_p.at[:H, 0:H].set(w_hr.T)
    whh_p = whh_p.at[:H, Hp:Hp + H].set(w_hz.T)
    whh_p = whh_p.at[:H, 2 * Hp:2 * Hp + H].set(w_hn.T)
    if fold_bias:
        # b_hn folded into the matmul via the constant-1 bias lane of h
        whh_p = whh_p.at[H, 2 * Hp:2 * Hp + H].set(b_hh[2 * H:])
    whh_k = whh_p.astype(jnp.bfloat16)

    in_specs = [
        pl.BlockSpec((t_chunk, b_block, 3 * Hp), lambda b, c: (c, b, 0)),  # gx
        pl.BlockSpec((Hp, 3 * Hp), lambda b, c: (0, 0)),                   # W_hh
    ]
    args = [gx, whh_k]
    if not fold_bias:
        bhn_k = jnp.zeros((1, Hp), jnp.float32).at[0, :H].set(b_hh[2 * H:])
        in_specs.append(pl.BlockSpec((1, Hp), lambda b, c: (0, 0)))
        args.append(bhn_k)

    grid = (B // b_block, T_pad // t_chunk)
    grid_spec = pltpu.PrefetchScalarGridSpec(
        num_scalar_prefetch=0,
        grid=grid,
        in_specs=in_specs,
        out_specs=pl.BlockSpec((b_block, Hp), lambda b, c: (b, 0)),
        scratch_shapes=[pltpu.VMEM((b_block, Hp), jnp.float32)],  # carried h
    )

    h_last = pl.pallas_call(
        functools.partial(_gru_recurrence_kernel,
                          hidden_pad=Hp, bias_lane=bias_lane,
                          t_chunk=t_chunk, unroll=8),
        out_shape=jax.ShapeDtypeStruct((B, Hp), jnp.float32),
        grid_spec=grid_spec,
        compiler_params=pltpu.CompilerParams(
            # batch blocks independent (megacore), time carry is sequential
            dimension_semantics=("parallel", "arbitrary"),
            vmem_limit_bytes=64 * 1024 * 1024,
        ),
    )(*args)

    # ---- Linear head in XLA (O=1 would be a degenerate 1-lane store in-kernel)
    return h_last[:, :H] @ w_lin.T + b_lin


def gru_forward_ref(x, w_ih, w_hh, b_ih, b_hh, w_lin, b_lin):
    """Pure-JAX f32 reference of the PyTorch GRU forward (for validation)."""
    B, T, D = x.shape
    H = w_hh.shape[1]
    w_ir, w_iz, w_in = jnp.split(w_ih, 3, axis=0)
    w_hr, w_hz, w_hn = jnp.split(w_hh, 3, axis=0)
    b_ir, b_iz, b_in = jnp.split(b_ih, 3)
    b_hr, b_hz, b_hn = jnp.split(b_hh, 3)
    h = jnp.zeros((B, H), jnp.float32)
    for t in range(T):
        xt = x[:, t, :]
        r = jax.nn.sigmoid(xt @ w_ir.T + b_ir + h @ w_hr.T + b_hr)
        z = jax.nn.sigmoid(xt @ w_iz.T + b_iz + h @ w_hz.T + b_hz)
        n = jnp.tanh(xt @ w_in.T + b_in + r * (h @ w_hn.T + b_hn))
        h = (1.0 - z) * n + z * h
    return h @ w_lin.T + b_lin


if __name__ == "__main__":
    # Small deterministic shapes: batch=2, seq=8, input_dim=8, hidden=32, out=1.
    B, T, D, H, O = 2, 8, 8, 32, 1

    key = jax.random.PRNGKey(0)
    ks = jax.random.split(key, 7)
    scale = 1.0 / jnp.sqrt(H)  # PyTorch-style uniform(-1/sqrt(H), 1/sqrt(H))

    w_ih = jax.random.uniform(ks[0], (3 * H, D), jnp.float32, -scale, scale)
    w_hh = jax.random.uniform(ks[1], (3 * H, H), jnp.float32, -scale, scale)
    b_ih = jax.random.uniform(ks[2], (3 * H,), jnp.float32, -scale, scale)
    b_hh = jax.random.uniform(ks[3], (3 * H,), jnp.float32, -scale, scale)
    w_lin = jax.random.uniform(ks[4], (O, H), jnp.float32, -scale, scale)
    b_lin = jax.random.uniform(ks[5], (O,), jnp.float32, -scale, scale)

    x = jax.random.normal(ks[6], (B, T, D), jnp.float32)

    out = gru_forward(x, w_ih, w_hh, b_ih, b_hh, w_lin, b_lin)
    out = jax.block_until_ready(out)

    ref = gru_forward_ref(x, w_ih, w_hh, b_ih, b_hh, w_lin, b_lin)
    assert out.shape == (B, O)
    # bf16 recurrent-matmul operands / bf16 gx stream (f32 accumulation &
    # carried state) -> relaxed tolerance vs the f32 reference.
    assert jnp.allclose(out, ref, atol=3e-2, rtol=3e-2), (out, ref)

    print("KERNEL_OK")
</pallas_src>

<mosaic_0001>
module attributes {stable_mosaic.version = 11 : i64} {
  func.func @_gru_recurrence_kernel(%arg0: i32, %arg1: i32, %arg2: memref<8x2x384xbf16, #tpu.memory_space<vmem>>, %arg3: memref<128x384xbf16, #tpu.memory_space<vmem>>, %arg4: memref<2x128xf32, #tpu.memory_space<vmem>>, %arg5: memref<2x128xf32, #tpu.memory_space<vmem>>) attributes {dimension_semantics = [#tpu.dimension_semantics<parallel>, #tpu.dimension_semantics<arbitrary>], iteration_bounds = array<i64: 1, 1>, scalar_prefetch = 0 : i64, scratch_operands = 1 : i64, tpu.core_type = #tpu.core_type<tc>, window_params = [{transform_indices = @transform_0, window_bounds = array<i64: 8, 2, 384>}, {pipeline_mode = #tpu.pipeline_mode<synchronous>, transform_indices = @transform_1, window_bounds = array<i64: 128, 384>}, {transform_indices = @transform_2, window_bounds = array<i64: 2, 128>}]} {
    %c0_i32 = arith.constant 0 : i32
    %0 = arith.cmpi eq, %arg1, %c0_i32 : i32
    %1 = arith.extui %0 : i1 to i32
    %c0_i32_0 = arith.constant 0 : i32
    %2 = arith.cmpi ne, %1, %c0_i32_0 : i32
    scf.if %2 {
      %257 = tpu.iota {dimensions = array<i32: 1>} : vector<2x128xi32>
      %c32_i32 = arith.constant 32 : i32
      %258 = vector.broadcast %c32_i32 : i32 to vector<2x128xi32>
      %259 = arith.cmpi eq, %257, %258 : vector<2x128xi32>
      %cst_56 = arith.constant 1.000000e+00 : f32
      %cst_57 = arith.constant 0.000000e+00 : f32
      %260 = vector.broadcast %cst_56 : f32 to vector<2x128xf32>
      %261 = vector.broadcast %cst_57 : f32 to vector<2x128xf32>
      %262 = arith.select %259, %260, %261 : vector<2x128xi1>, vector<2x128xf32>
      %c0_58 = arith.constant 0 : index
      %c0_59 = arith.constant 0 : index
      %263 = vector.load %arg5[%c0_58, %c0_59] : memref<2x128xf32, #tpu.memory_space<vmem>>, vector<2x128xf32>
      tpu.vector_store %arg5[%c0_58, %c0_59], %262 {strides = array<i32>} : memref<2x128xf32, #tpu.memory_space<vmem>>, vector<2x128xf32>,
    } else {
    }
    %c0 = arith.constant 0 : index
    %c0_1 = arith.constant 0 : index
    %3 = vector.load %arg3[%c0, %c0_1] : memref<128x384xbf16, #tpu.memory_space<vmem>>, vector<128x384xbf16>
    %c0_2 = arith.constant 0 : index
    %c0_3 = arith.constant 0 : index
    %4 = vector.load %arg5[%c0_2, %c0_3] : memref<2x128xf32, #tpu.memory_space<vmem>>, vector<2x128xf32>
    %c0_4 = arith.constant 0 : index
    %c0_5 = arith.constant 0 : index
    %c0_6 = arith.constant 0 : index
    %5 = vector.load %arg2[%c0_4, %c0_5, %c0_6] : memref<8x2x384xbf16, #tpu.memory_space<vmem>>, vector<1x2x384xbf16>
    %6 = vector.shape_cast %5 : vector<1x2x384xbf16> to vector<2x384xbf16>
    %7 = arith.extf %6 : vector<2x384xbf16> to vector<2x384xf32>
    %8 = arith.truncf %4 : vector<2x128xf32> to vector<2x128xbf16>
    %cst = arith.constant dense<0.000000e+00> : vector<2x384xf32>
    %9 = tpu.matmul %8, %3, %cst {dimension_numbers = #tpu.dot_dimension_numbers<[1], [0], [0], [1], [0, 0, 1, 1], [], []>} : vector<2x128xbf16>, vector<128x384xbf16>, vector<2x384xf32> -> vector<2x384xf32>
    %10 = vector.extract_strided_slice %7 {offsets = [0, 0], sizes = [2, 128], strides = [1, 1]} : vector<2x384xf32> to vector<2x128xf32>
    %11 = vector.extract_strided_slice %9 {offsets = [0, 0], sizes = [2, 128], strides = [1, 1]} : vector<2x384xf32> to vector<2x128xf32>
    %12 = arith.addf %10, %11 : vector<2x128xf32>
    %13 = arith.negf %12 : vector<2x128xf32>
    %14 = math.exp %13 : vector<2x128xf32>
    %cst_7 = arith.constant 1.000000e+00 : f32
    %15 = vector.broadcast %cst_7 : f32 to vector<2x128xf32>
    %16 = arith.addf %15, %14 : vector<2x128xf32>
    %17 = arith.divf %15, %16 : vector<2x128xf32>
    %18 = vector.extract_strided_slice %7 {offsets = [0, 128], sizes = [2, 128], strides = [1, 1]} : vector<2x384xf32> to vector<2x128xf32>
    %19 = vector.extract_strided_slice %9 {offsets = [0, 128], sizes = [2, 128], strides = [1, 1]} : vector<2x384xf32> to vector<2x128xf32>
    %20 = arith.addf %18, %19 : vector<2x128xf32>
    %21 = arith.negf %20 : vector<2x128xf32>
    %22 = math.exp %21 : vector<2x128xf32>
    %cst_8 = arith.constant 1.000000e+00 : f32
    %23 = vector.broadcast %cst_8 : f32 to vector<2x128xf32>
    %24 = arith.addf %23, %22 : vector<2x128xf32>
    %25 = arith.divf %23, %24 : vector<2x128xf32>
    %26 = vector.extract_strided_slice %9 {offsets = [0, 256], sizes = [2, 128], strides = [1, 1]} : vector<2x384xf32> to vector<2x128xf32>
    %27 = vector.extract_strided_slice %7 {offsets = [0, 256], sizes = [2, 128], strides = [1, 1]} : vector<2x384xf32> to vector<2x128xf32>
    %28 = arith.mulf %17, %26 : vector<2x128xf32>
    %29 = arith.addf %27, %28 : vector<2x128xf32>
    %30 = math.tanh %29 : vector<2x128xf32>
    %cst_9 = arith.constant 1.000000e+00 : f32
    %31 = vector.broadcast %cst_9 : f32 to vector<2x128xf32>
    %32 = arith.subf %31, %25 : vector<2x128xf32>
    %33 = arith.mulf %32, %30 : vector<2x128xf32>
    %34 = arith.mulf %25, %4 : vector<2x128xf32>
    %35 = arith.addf %33, %34 : vector<2x128xf32>
    %c1 = arith.constant 1 : index
    %c0_10 = arith.constant 0 : index
    %c0_11 = arith.constant 0 : index
    %36 = vector.load %arg2[%c1, %c0_10, %c0_11] : memref<8x2x384xbf16, #tpu.memory_space<vmem>>, vector<1x2x384xbf16>
    %37 = vector.shape_cast %36 : vector<1x2x384xbf16> to vector<2x384xbf16>
    %38 = arith.extf %37 : vector<2x384xbf16> to vector<2x384xf32>
    %39 = arith.truncf %35 : vector<2x128xf32> to vector<2x128xbf16>
    %cst_12 = arith.constant dense<0.000000e+00> : vector<2x384xf32>
    %40 = tpu.matmul %39, %3, %cst_12 {dimension_numbers = #tpu.dot_dimension_numbers<[1], [0], [0], [1], [0, 0, 1, 1], [], []>} : vector<2x128xbf16>, vector<128x384xbf16>, vector<2x384xf32> -> vector<2x384xf32>
    %41 = vector.extract_strided_slice %38 {offsets = [0, 0], sizes = [2, 128], strides = [1, 1]} : vector<2x384xf32> to vector<2x128xf32>
    %42 = vector.extract_strided_slice %40 {offsets = [0, 0], sizes = [2, 128], strides = [1, 1]} : vector<2x384xf32> to vector<2x128xf32>
    %43 = arith.addf %41, %42 : vector<2x128xf32>
    %44 = arith.negf %43 : vector<2x128xf32>
    %45 = math.exp %44 : vector<2x128xf32>
    %cst_13 = arith.constant 1.000000e+00 : f32
    %46 = vector.broadcast %cst_13 : f32 to vector<2x128xf32>
    %47 = arith.addf %46, %45 : vector<2x128xf32>
    %48 = arith.divf %46, %47 : vector<2x128xf32>
    %49 = vector.extract_strided_slice %38 {offsets = [0, 128], sizes = [2, 128], strides = [1, 1]} : vector<2x384xf32> to vector<2x128xf32>
    %50 = vector.extract_strided_slice %40 {offsets = [0, 128], sizes = [2, 128], strides = [1, 1]} : vector<2x384xf32> to vector<2x128xf32>
    %51 = arith.addf %49, %50 : vector<2x128xf32>
    %52 = arith.negf %51 : vector<2x128xf32>
    %53 = math.exp %52 : vector<2x128xf32>
    %cst_14 = arith.constant 1.000000e+00 : f32
    %54 = vector.broadcast %cst_14 : f32 to vector<2x128xf32>
    %55 = arith.addf %54, %53 : vector<2x128xf32>
    %56 = arith.divf %54, %55 : vector<2x128xf32>
    %57 = vector.extract_strided_slice %40 {offsets = [0, 256], sizes = [2, 128], strides = [1, 1]} : vector<2x384xf32> to vector<2x128xf32>
    %58 = vector.extract_strided_slice %38 {offsets = [0, 256], sizes = [2, 128], strides = [1, 1]} : vector<2x384xf32> to vector<2x128xf32>
    %59 = arith.mulf %48, %57 : vector<2x128xf32>
    %60 = arith.addf %58, %59 : vector<2x128xf32>
    %61 = math.tanh %60 : vector<2x128xf32>
    %cst_15 = arith.constant 1.000000e+00 : f32
    %62 = vector.broadcast %cst_15 : f32 to vector<2x128xf32>
    %63 = arith.subf %62, %56 : vector<2x128xf32>
    %64 = arith.mulf %63, %61 : vector<2x128xf32>
    %65 = arith.mulf %56, %35 : vector<2x128xf32>
    %66 = arith.addf %64, %65 : vector<2x128xf32>
    %c2 = arith.constant 2 : index
    %c0_16 = arith.constant 0 : index
    %c0_17 = arith.constant 0 : index
    %67 = vector.load %arg2[%c2, %c0_16, %c0_17] : memref<8x2x384xbf16, #tpu.memory_space<vmem>>, vector<1x2x384xbf16>
    %68 = vector.shape_cast %67 : vector<1x2x384xbf16> to vector<2x384xbf16>
    %69 = arith.extf %68 : vector<2x384xbf16> to vector<2x384xf32>
    %70 = arith.truncf %66 : vector<2x128xf32> to vector<2x128xbf16>
    %cst_18 = arith.constant dense<0.000000e+00> : vector<2x384xf32>
    %71 = tpu.matmul %70, %3, %cst_18 {dimension_numbers = #tpu.dot_dimension_numbers<[1], [0], [0], [1], [0, 0, 1, 1], [], []>} : vector<2x128xbf16>, vector<128x384xbf16>, vector<2x384xf32> -> vector<2x384xf32>
    %72 = vector.extract_strided_slice %69 {offsets = [0, 0], sizes = [2, 128], strides = [1, 1]} : vector<2x384xf32> to vector<2x128xf32>
    %73 = vector.extract_strided_slice %71 {offsets = [0, 0], sizes = [2, 128], strides = [1, 1]} : vector<2x384xf32> to vector<2x128xf32>
    %74 = arith.addf %72, %73 : vector<2x128xf32>
    %75 = arith.negf %74 : vector<2x128xf32>
    %76 = math.exp %75 : vector<2x128xf32>
    %cst_19 = arith.constant 1.000000e+00 : f32
    %77 = vector.broadcast %cst_19 : f32 to vector<2x128xf32>
    %78 = arith.addf %77, %76 : vector<2x128xf32>
    %79 = arith.divf %77, %78 : vector<2x128xf32>
    %80 = vector.extract_strided_slice %69 {offsets = [0, 128], sizes = [2, 128], strides = [1, 1]} : vector<2x384xf32> to vector<2x128xf32>
    %81 = vector.extract_strided_slice %71 {offsets = [0, 128], sizes = [2, 128], strides = [1, 1]} : vector<2x384xf32> to vector<2x128xf32>
    %82 = arith.addf %80, %81 : vector<2x128xf32>
    %83 = arith.negf %82 : vector<2x128xf32>
    %84 = math.exp %83 : vector<2x128xf32>
    %cst_20 = arith.constant 1.000000e+00 : f32
    %85 = vector.broadcast %cst_20 : f32 to vector<2x128xf32>
    %86 = arith.addf %85, %84 : vector<2x128xf32>
    %87 = arith.divf %85, %86 : vector<2x128xf32>
    %88 = vector.extract_strided_slice %71 {offsets = [0, 256], sizes = [2, 128], strides = [1, 1]} : vector<2x384xf32> to vector<2x128xf32>
    %89 = vector.extract_strided_slice %69 {offsets = [0, 256], sizes = [2, 128], strides = [1, 1]} : vector<2x384xf32> to vector<2x128xf32>
    %90 = arith.mulf %79, %88 : vector<2x128xf32>
    %91 = arith.addf %89, %90 : vector<2x128xf32>
    %92 = math.tanh %91 : vector<2x128xf32>
    %cst_21 = arith.constant 1.000000e+00 : f32
    %93 = vector.broadcast %cst_21 : f32 to vector<2x128xf32>
    %94 = arith.subf %93, %87 : vector<2x128xf32>
    %95 = arith.mulf %94, %92 : vector<2x128xf32>
    %96 = arith.mulf %87, %66 : vector<2x128xf32>
    %97 = arith.addf %95, %96 : vector<2x128xf32>
    %c3 = arith.constant 3 : index
    %c0_22 = arith.constant 0 : index
    %c0_23 = arith.constant 0 : index
    %98 = vector.load %arg2[%c3, %c0_22, %c0_23] : memref<8x2x384xbf16, #tpu.memory_space<vmem>>, vector<1x2x384xbf16>
    %99 = vector.shape_cast %98 : vector<1x2x384xbf16> to vector<2x384xbf16>
    %100 = arith.extf %99 : vector<2x384xbf16> to vector<2x384xf32>
    %101 = arith.truncf %97 : vector<2x128xf32> to vector<2x128xbf16>
    %cst_24 = arith.constant dense<0.000000e+00> : vector<2x384xf32>
    %102 = tpu.matmul %101, %3, %cst_24 {dimension_numbers = #tpu.dot_dimension_numbers<[1], [0], [0], [1], [0, 0, 1, 1], [], []>} : vector<2x128xbf16>, vector<128x384xbf16>, vector<2x384xf32> -> vector<2x384xf32>
    %103 = vector.extract_strided_slice %100 {offsets = [0, 0], sizes = [2, 128], strides = [1, 1]} : vector<2x384xf32> to vector<2x128xf32>
    %104 = vector.extract_strided_slice %102 {offsets = [0, 0], sizes = [2, 128], strides = [1, 1]} : vector<2x384xf32> to vector<2x128xf32>
    %105 = arith.addf %103, %104 : vector<2x128xf32>
    %106 = arith.negf %105 : vector<2x128xf32>
    %107 = math.exp %106 : vector<2x128xf32>
    %cst_25 = arith.constant 1.000000e+00 : f32
    %108 = vector.broadcast %cst_25 : f32 to vector<2x128xf32>
    %109 = arith.addf %108, %107 : vector<2x128xf32>
    %110 = arith.divf %108, %109 : vector<2x128xf32>
    %111 = vector.extract_strided_slice %100 {offsets = [0, 128], sizes = [2, 128], strides = [1, 1]} : vector<2x384xf32> to vector<2x128xf32>
    %112 = vector.extract_strided_slice %102 {offsets = [0, 128], sizes = [2, 128], strides = [1, 1]} : vector<2x384xf32> to vector<2x128xf32>
    %113 = arith.addf %111, %112 : vector<2x128xf32>
    %114 = arith.negf %113 : vector<2x128xf32>
    %115 = math.exp %114 : vector<2x128xf32>
    %cst_26 = arith.constant 1.000000e+00 : f32
    %116 = vector.broadcast %cst_26 : f32 to vector<2x128xf32>
    %117 = arith.addf %116, %115 : vector<2x128xf32>
    %118 = arith.divf %116, %117 : vector<2x128xf32>
    %119 = vector.extract_strided_slice %102 {offsets = [0, 256], sizes = [2, 128], strides = [1, 1]} : vector<2x384xf32> to vector<2x128xf32>
    %120 = vector.extract_strided_slice %100 {offsets = [0, 256], sizes = [2, 128], strides = [1, 1]} : vector<2x384xf32> to vector<2x128xf32>
    %121 = arith.mulf %110, %119 : vector<2x128xf32>
    %122 = arith.addf %120, %121 : vector<2x128xf32>
    %123 = math.tanh %122 : vector<2x128xf32>
    %cst_27 = arith.constant 1.000000e+00 : f32
    %124 = vector.broadcast %cst_27 : f32 to vector<2x128xf32>
    %125 = arith.subf %124, %118 : vector<2x128xf32>
    %126 = arith.mulf %125, %123 : vector<2x128xf32>
    %127 = arith.mulf %118, %97 : vector<2x128xf32>
    %128 = arith.addf %126, %127 : vector<2x128xf32>
    %c4 = arith.constant 4 : index
    %c0_28 = arith.constant 0 : index
    %c0_29 = arith.constant 0 : index
    %129 = vector.load %arg2[%c4, %c0_28, %c0_29] : memref<8x2x384xbf16, #tpu.memory_space<vmem>>, vector<1x2x384xbf16>
    %130 = vector.shape_cast %129 : vector<1x2x384xbf16> to vector<2x384xbf16>
    %131 = arith.extf %130 : vector<2x384xbf16> to vector<2x384xf32>
    %132 = arith.truncf %128 : vector<2x128xf32> to vector<2x128xbf16>
    %cst_30 = arith.constant dense<0.000000e+00> : vector<2x384xf32>
    %133 = tpu.matmul %132, %3, %cst_30 {dimension_numbers = #tpu.dot_dimension_numbers<[1], [0], [0], [1], [0, 0, 1, 1], [], []>} : vector<2x128xbf16>, vector<128x384xbf16>, vector<2x384xf32> -> vector<2x384xf32>
    %134 = vector.extract_strided_slice %131 {offsets = [0, 0], sizes = [2, 128], strides = [1, 1]} : vector<2x384xf32> to vector<2x128xf32>
    %135 = vector.extract_strided_slice %133 {offsets = [0, 0], sizes = [2, 128], strides = [1, 1]} : vector<2x384xf32> to vector<2x128xf32>
    %136 = arith.addf %134, %135 : vector<2x128xf32>
    %137 = arith.negf %136 : vector<2x128xf32>
    %138 = math.exp %137 : vector<2x128xf32>
    %cst_31 = arith.constant 1.000000e+00 : f32
    %139 = vector.broadcast %cst_31 : f32 to vector<2x128xf32>
    %140 = arith.addf %139, %138 : vector<2x128xf32>
    %141 = arith.divf %139, %140 : vector<2x128xf32>
    %142 = vector.extract_strided_slice %131 {offsets = [0, 128], sizes = [2, 128], strides = [1, 1]} : vector<2x384xf32> to vector<2x128xf32>
    %143 = vector.extract_strided_slice %133 {offsets = [0, 128], sizes = [2, 128], strides = [1, 1]} : vector<2x384xf32> to vector<2x128xf32>
    %144 = arith.addf %142, %143 : vector<2x128xf32>
    %145 = arith.negf %144 : vector<2x128xf32>
    %146 = math.exp %145 : vector<2x128xf32>
    %cst_32 = arith.constant 1.000000e+00 : f32
    %147 = vector.broadcast %cst_32 : f32 to vector<2x128xf32>
    %148 = arith.addf %147, %146 : vector<2x128xf32>
    %149 = arith.divf %147, %148 : vector<2x128xf32>
    %150 = vector.extract_strided_slice %133 {offsets = [0, 256], sizes = [2, 128], strides = [1, 1]} : vector<2x384xf32> to vector<2x128xf32>
    %151 = vector.extract_strided_slice %131 {offsets = [0, 256], sizes = [2, 128], strides = [1, 1]} : vector<2x384xf32> to vector<2x128xf32>
    %152 = arith.mulf %141, %150 : vector<2x128xf32>
    %153 = arith.addf %151, %152 : vector<2x128xf32>
    %154 = math.tanh %153 : vector<2x128xf32>
    %cst_33 = arith.constant 1.000000e+00 : f32
    %155 = vector.broadcast %cst_33 : f32 to vector<2x128xf32>
    %156 = arith.subf %155, %149 : vector<2x128xf32>
    %157 = arith.mulf %156, %154 : vector<2x128xf32>
    %158 = arith.mulf %149, %128 : vector<2x128xf32>
    %159 = arith.addf %157, %158 : vector<2x128xf32>
    %c5 = arith.constant 5 : index
    %c0_34 = arith.constant 0 : index
    %c0_35 = arith.constant 0 : index
    %160 = vector.load %arg2[%c5, %c0_34, %c0_35] : memref<8x2x384xbf16, #tpu.memory_space<vmem>>, vector<1x2x384xbf16>
    %161 = vector.shape_cast %160 : vector<1x2x384xbf16> to vector<2x384xbf16>
    %162 = arith.extf %161 : vector<2x384xbf16> to vector<2x384xf32>
    %163 = arith.truncf %159 : vector<2x128xf32> to vector<2x128xbf16>
    %cst_36 = arith.constant dense<0.000000e+00> : vector<2x384xf32>
    %164 = tpu.matmul %163, %3, %cst_36 {dimension_numbers = #tpu.dot_dimension_numbers<[1], [0], [0], [1], [0, 0, 1, 1], [], []>} : vector<2x128xbf16>, vector<128x384xbf16>, vector<2x384xf32> -> vector<2x384xf32>
    %165 = vector.extract_strided_slice %162 {offsets = [0, 0], sizes = [2, 128], strides = [1, 1]} : vector<2x384xf32> to vector<2x128xf32>
    %166 = vector.extract_strided_slice %164 {offsets = [0, 0], sizes = [2, 128], strides = [1, 1]} : vector<2x384xf32> to vector<2x128xf32>
    %167 = arith.addf %165, %166 : vector<2x128xf32>
    %168 = arith.negf %167 : vector<2x128xf32>
    %169 = math.exp %168 : vector<2x128xf32>
    %cst_37 = arith.constant 1.000000e+00 : f32
    %170 = vector.broadcast %cst_37 : f32 to vector<2x128xf32>
    %171 = arith.addf %170, %169 : vector<2x128xf32>
    %172 = arith.divf %170, %171 : vector<2x128xf32>
    %173 = vector.extract_strided_slice %162 {offsets = [0, 128], sizes = [2, 128], strides = [1, 1]} : vector<2x384xf32> to vector<2x128xf32>
    %174 = vector.extract_strided_slice %164 {offsets = [0, 128], sizes = [2, 128], strides = [1, 1]} : vector<2x384xf32> to vector<2x128xf32>
    %175 = arith.addf %173, %174 : vector<2x128xf32>
    %176 = arith.negf %175 : vector<2x128xf32>
    %177 = math.exp %176 : vector<2x128xf32>
    %cst_38 = arith.constant 1.000000e+00 : f32
    %178 = vector.broadcast %cst_38 : f32 to vector<2x128xf32>
    %179 = arith.addf %178, %177 : vector<2x128xf32>
    %180 = arith.divf %178, %179 : vector<2x128xf32>
    %181 = vector.extract_strided_slice %164 {offsets = [0, 256], sizes = [2, 128], strides = [1, 1]} : vector<2x384xf32> to vector<2x128xf32>
    %182 = vector.extract_strided_slice %162 {offsets = [0, 256], sizes = [2, 128], strides = [1, 1]} : vector<2x384xf32> to vector<2x128xf32>
    %183 = arith.mulf %172, %181 : vector<2x128xf32>
    %184 = arith.addf %182, %183 : vector<2x128xf32>
    %185 = math.tanh %184 : vector<2x128xf32>
    %cst_39 = arith.constant 1.000000e+00 : f32
    %186 = vector.broadcast %cst_39 : f32 to vector<2x128xf32>
    %187 = arith.subf %186, %180 : vector<2x128xf32>
    %188 = arith.mulf %187, %185 : vector<2x128xf32>
    %189 = arith.mulf %180, %159 : vector<2x128xf32>
    %190 = arith.addf %188, %189 : vector<2x128xf32>
    %c6 = arith.constant 6 : index
    %c0_40 = arith.constant 0 : index
    %c0_41 = arith.constant 0 : index
    %191 = vector.load %arg2[%c6, %c0_40, %c0_41] : memref<8x2x384xbf16, #tpu.memory_space<vmem>>, vector<1x2x384xbf16>
    %192 = vector.shape_cast %191 : vector<1x2x384xbf16> to vector<2x384xbf16>
    %193 = arith.extf %192 : vector<2x384xbf16> to vector<2x384xf32>
    %194 = arith.truncf %190 : vector<2x128xf32> to vector<2x128xbf16>
    %cst_42 = arith.constant dense<0.000000e+00> : vector<2x384xf32>
    %195 = tpu.matmul %194, %3, %cst_42 {dimension_numbers = #tpu.dot_dimension_numbers<[1], [0], [0], [1], [0, 0, 1, 1], [], []>} : vector<2x128xbf16>, vector<128x384xbf16>, vector<2x384xf32> -> vector<2x384xf32>
    %196 = vector.extract_strided_slice %193 {offsets = [0, 0], sizes = [2, 128], strides = [1, 1]} : vector<2x384xf32> to vector<2x128xf32>
    %197 = vector.extract_strided_slice %195 {offsets = [0, 0], sizes = [2, 128], strides = [1, 1]} : vector<2x384xf32> to vector<2x128xf32>
    %198 = arith.addf %196, %197 : vector<2x128xf32>
    %199 = arith.negf %198 : vector<2x128xf32>
    %200 = math.exp %199 : vector<2x128xf32>
    %cst_43 = arith.constant 1.000000e+00 : f32
    %201 = vector.broadcast %cst_43 : f32 to vector<2x128xf32>
    %202 = arith.addf %201, %200 : vector<2x128xf32>
    %203 = arith.divf %201, %202 : vector<2x128xf32>
    %204 = vector.extract_strided_slice %193 {offsets = [0, 128], sizes = [2, 128], strides = [1, 1]} : vector<2x384xf32> to vector<2x128xf32>
    %205 = vector.extract_strided_slice %195 {offsets = [0, 128], sizes = [2, 128], strides = [1, 1]} : vector<2x384xf32> to vector<2x128xf32>
    %206 = arith.addf %204, %205 : vector<2x128xf32>
    %207 = arith.negf %206 : vector<2x128xf32>
    %208 = math.exp %207 : vector<2x128xf32>
    %cst_44 = arith.constant 1.000000e+00 : f32
    %209 = vector.broadcast %cst_44 : f32 to vector<2x128xf32>
    %210 = arith.addf %209, %208 : vector<2x128xf32>
    %211 = arith.divf %209, %210 : vector<2x128xf32>
    %212 = vector.extract_strided_slice %195 {offsets = [0, 256], sizes = [2, 128], strides = [1, 1]} : vector<2x384xf32> to vector<2x128xf32>
    %213 = vector.extract_strided_slice %193 {offsets = [0, 256], sizes = [2, 128], strides = [1, 1]} : vector<2x384xf32> to vector<2x128xf32>
    %214 = arith.mulf %203, %212 : vector<2x128xf32>
    %215 = arith.addf %213, %214 : vector<2x128xf32>
    %216 = math.tanh %215 : vector<2x128xf32>
    %cst_45 = arith.constant 1.000000e+00 : f32
    %217 = vector.broadcast %cst_45 : f32 to vector<2x128xf32>
    %218 = arith.subf %217, %211 : vector<2x128xf32>
    %219 = arith.mulf %218, %216 : vector<2x128xf32>
    %220 = arith.mulf %211, %190 : vector<2x128xf32>
    %221 = arith.addf %219, %220 : vector<2x128xf32>
    %c7 = arith.constant 7 : index
    %c0_46 = arith.constant 0 : index
    %c0_47 = arith.constant 0 : index
    %222 = vector.load %arg2[%c7, %c0_46, %c0_47] : memref<8x2x384xbf16, #tpu.memory_space<vmem>>, vector<1x2x384xbf16>
    %223 = vector.shape_cast %222 : vector<1x2x384xbf16> to vector<2x384xbf16>
    %224 = arith.extf %223 : vector<2x384xbf16> to vector<2x384xf32>
    %225 = arith.truncf %221 : vector<2x128xf32> to vector<2x128xbf16>
    %cst_48 = arith.constant dense<0.000000e+00> : vector<2x384xf32>
    %226 = tpu.matmul %225, %3, %cst_48 {dimension_numbers = #tpu.dot_dimension_numbers<[1], [0], [0], [1], [0, 0, 1, 1], [], []>} : vector<2x128xbf16>, vector<128x384xbf16>, vector<2x384xf32> -> vector<2x384xf32>
    %227 = vector.extract_strided_slice %224 {offsets = [0, 0], sizes = [2, 128], strides = [1, 1]} : vector<2x384xf32> to vector<2x128xf32>
    %228 = vector.extract_strided_slice %226 {offsets = [0, 0], sizes = [2, 128], strides = [1, 1]} : vector<2x384xf32> to vector<2x128xf32>
    %229 = arith.addf %227, %228 : vector<2x128xf32>
    %230 = arith.negf %229 : vector<2x128xf32>
    %231 = math.exp %230 : vector<2x128xf32>
    %cst_49 = arith.constant 1.000000e+00 : f32
    %232 = vector.broadcast %cst_49 : f32 to vector<2x128xf32>
    %233 = arith.addf %232, %231 : vector<2x128xf32>
    %234 = arith.divf %232, %233 : vector<2x128xf32>
    %235 = vector.extract_strided_slice %224 {offsets = [0, 128], sizes = [2, 128], strides = [1, 1]} : vector<2x384xf32> to vector<2x128xf32>
    %236 = vector.extract_strided_slice %226 {offsets = [0, 128], sizes = [2, 128], strides = [1, 1]} : vector<2x384xf32> to vector<2x128xf32>
    %237 = arith.addf %235, %236 : vector<2x128xf32>
    %238 = arith.negf %237 : vector<2x128xf32>
    %239 = math.exp %238 : vector<2x128xf32>
    %cst_50 = arith.constant 1.000000e+00 : f32
    %240 = vector.broadcast %cst_50 : f32 to vector<2x128xf32>
    %241 = arith.addf %240, %239 : vector<2x128xf32>
    %242 = arith.divf %240, %241 : vector<2x128xf32>
    %243 = vector.extract_strided_slice %226 {offsets = [0, 256], sizes = [2, 128], strides = [1, 1]} : vector<2x384xf32> to vector<2x128xf32>
    %244 = vector.extract_strided_slice %224 {offsets = [0, 256], sizes = [2, 128], strides = [1, 1]} : vector<2x384xf32> to vector<2x128xf32>
    %245 = arith.mulf %234, %243 : vector<2x128xf32>
    %246 = arith.addf %244, %245 : vector<2x128xf32>
    %247 = math.tanh %246 : vector<2x128xf32>
    %cst_51 = arith.constant 1.000000e+00 : f32
    %248 = vector.broadcast %cst_51 : f32 to vector<2x128xf32>
    %249 = arith.subf %248, %242 : vector<2x128xf32>
    %250 = arith.mulf %249, %247 : vector<2x128xf32>
    %251 = arith.mulf %242, %221 : vector<2x128xf32>
    %252 = arith.addf %250, %251 : vector<2x128xf32>
    %c0_52 = arith.constant 0 : index
    %c0_53 = arith.constant 0 : index
    %253 = vector.load %arg5[%c0_52, %c0_53] : memref<2x128xf32, #tpu.memory_space<vmem>>, vector<2x128xf32>
    tpu.vector_store %arg5[%c0_52, %c0_53], %252 {strides = array<i32>} : memref<2x128xf32, #tpu.memory_space<vmem>>, vector<2x128xf32>,
    %c0_i32_54 = arith.constant 0 : i32
    %254 = arith.cmpi eq, %arg1, %c0_i32_54 : i32
    %255 = arith.extui %254 : i1 to i32
    %c0_i32_55 = arith.constant 0 : i32
    %256 = arith.cmpi ne, %255, %c0_i32_55 : i32
    scf.if %256 {
      %c0_56 = arith.constant 0 : index
      %c0_57 = arith.constant 0 : index
      %257 = vector.load %arg4[%c0_56, %c0_57] : memref<2x128xf32, #tpu.memory_space<vmem>>, vector<2x128xf32>
      tpu.vector_store %arg4[%c0_56, %c0_57], %252 {strides = array<i32>} : memref<2x128xf32, #tpu.memory_space<vmem>>, vector<2x128xf32>,
    } else {
    }
    return
  }
  func.func @transform_0(%arg0: i32, %arg1: i32) -> (i32, i32, i32) {
    %c0_i32 = arith.constant 0 : i32
    %c0_i32_0 = arith.constant 0 : i32
    return %arg1, %arg0, %c0_i32 : i32, i32, i32
  }
  func.func @transform_1(%arg0: i32, %arg1: i32) -> (i32, i32) {
    %c0_i32 = arith.constant 0 : i32
    %c0_i32_0 = arith.constant 0 : i32
    %c0_i32_1 = arith.constant 0 : i32
    return %c0_i32, %c0_i32_0 : i32, i32
  }
  func.func @transform_2(%arg0: i32, %arg1: i32) -> (i32, i32) {
    %c0_i32 = arith.constant 0 : i32
    %c0_i32_0 = arith.constant 0 : i32
    return %arg0, %c0_i32 : i32, i32
  }
}

</mosaic_0001>

<bundles_post_ra>
// kernel: gru_forward.1
= control target key start
LH: loop header
LB: loop body
LE: loop exit
PB: predicated region body
PF: predicated region fallthrough
CT: control target
= control target key end

     0   :  { %7 = vsyncpa [#allocation4], 0  ;;  %s2010_s0 = inlined_call_operand.hbm [shape: bf16[8,2,384], index: 0, kind: input, shape index: {}]   ;;  %s2011_s1 = inlined_call_operand.hbm [shape: bf16[128,384], index: 1, kind: input, shape index: {}]   ;;  %s2012_s2 = inlined_call_operand.hbm [shape: f32[2,128], index: 2, kind: output, shape index: {}]  }
   0x1   :  { %8 = vsyncpa [#allocation7], 0 }
   0x2   :  { %9 = vsyncpa [#allocation5], 0  ;;  %s1589_s9 = smov [#allocation3]   ;;  %s1517_s13 = scalar_lea.hbm %s2010_s0, 384 }
   0x3   :  { %s15_s10 = sshll.u32 %s1589_s9, 4  ;;  %p1518_p0 = scmp.ne.s32.totalorder %s2010_s0, %s1517_s13  ;;  %s16_s10 = int_to_ptr.vmem [resolvable:$true] %s15_s10 }
   0x4   :  { %p1521_p1 = scmp.lt.u32.totalorder %s1517_s13, %s2010_s0 }
   0x6   :  { %p1523_p2 = pnand %p1521_p1, %p1518_p0 }
   0x8   :  { %1526 = shalt.err (!%p1523_p2)
}
   0x9   :  { %s1527_s18 = scalar_lea.vmem %s16_s10, 384  ;;  %p1532_p4 = scmp.lt.s32.totalorder %s16_s10, %s16_s10 }
   0xa   :  { %p1528_p3 = scmp.ne.s32.totalorder %s16_s10, %s1527_s18  ;;  %p1533_p5 = scmp.lt.s32.totalorder %s1527_s18, %s1527_s18 }
   0xc   :  { %p1534_p6 = por %p1533_p5, %p1532_p4 }
   0xe   :  { %p1535_p7 = pnand %p1534_p6, %p1528_p3 }
  0x10   :  { %1538 = shalt.err (!%p1535_p7)
}
  0x11   :  { %s1590_s19 = smov 48   ;;  %s1591_s20 = smov 3  }
  0x12   :  { %21 = dma.hbm_to_vmem [thread:$0]  %s2010_s0, 384, %s16_s10, [#allocation4], %s1590_s19, %s1590_s19, %s1591_s20  }
  0x13   :  { %s1592_s23 = smov [#allocation6]   ;;  %s1539_s27 = scalar_lea.hbm %s2011_s1, 3072 }
  0x14   :  { %s27_s24 = sshll.u32 %s1592_s23, 4  ;;  %p1540_p8 = scmp.ne.s32.totalorder %s2011_s1, %s1539_s27  ;;  %s28_s24 = int_to_ptr.vmem [resolvable:$true] %s27_s24 }
  0x15   :  { %p1543_p9 = scmp.lt.u32.totalorder %s1539_s27, %s2011_s1 }
  0x17   :  { %p1545_p10 = pnand %p1543_p9, %p1540_p8 }
  0x19   :  { %1548 = shalt.err (!%p1545_p10)
}
  0x1a   :  { %s1549_s4 = scalar_lea.vmem %s28_s24, 3072  ;;  %p1554_p12 = scmp.lt.s32.totalorder %s28_s24, %s28_s24 }
  0x1b   :  { %p1550_p11 = scmp.ne.s32.totalorder %s28_s24, %s1549_s4  ;;  %p1555_p13 = scmp.lt.s32.totalorder %s1549_s4, %s1549_s4 }
  0x1d   :  { %p1556_p0 = por %p1555_p13, %p1554_p12 }
  0x1f   :  { %p1557_p1 = pnand %p1556_p0, %p1550_p11 }
  0x21   :  { %1560 = shalt.err (!%p1557_p1)
}
  0x22   :  { %s1593_s0 = smov 192   ;;  %s1594_s5 = smov 12  }
  0x23   :  { %33 = dma.hbm_to_vmem [thread:$0]  %s2011_s1, 3072, %s28_s24, [#allocation7], %s1593_s0, %s1593_s0, %s1594_s5  }
  0x24   :  { %1583 = dma.done.wait [#allocation4], 384  }
  0x25   :  { %1584 = vsyncadd [#allocation4], 4294966912 }
  0x26   :  { %1585 = dma.done.wait [#allocation7], 3072  }
  0x27   :  { %1586 = vsyncadd [#allocation7], 4294964224  ;;  %v45_v0 = vlaneseq  ;;  %v1595_v1 = vmov 0.0   ;;  %v1596_v2 = vmov 0   ;;  %vm1597_vm0 = vmmov 0   ;;  %s1598_s1 = smov [#allocation8]  }
  0x28   :  { %1231 = vmatprep.subr.bf16.mxu1 %v1595_v1  ;;  %246 = vmatprep.mubr.bf16.mxu0 %v1596_v2  ;;  %v1643_v5 = vld [vmem:[#allocation6 + $0x4] ss:$12 sps:$4 sm:$0xff]   ;;  %v1645_v6 = vld [vmem:[#allocation6] ss:$12 sps:$4 sm:$0xff]   ;;  %v1648_v7 = vld [vmem:[#allocation6 + $0x1c] ss:$12 sps:$4 sm:$0xff]  }
  0x29   :  { %v46_v3 = vand.u32 127, %v45_v0  ;;  %1247 = vmatprep.mubr.msk.bf16.mxu1 %vm1597_vm0, %v1595_v1  ;;  %214 = vmatprep.subr.bf16.mxu0 %v1643_v5  ;;  %v1651_v8 = vld [vmem:[#allocation6 + $0x18] ss:$12 sps:$4 sm:$0xff]   ;;  %v1654_v9 = vld [vmem:[#allocation6 + $0x34] ss:$12 sps:$4 sm:$0xff]   ;;  %s1109_s8 = sshll.u32 %s1598_s1, 4  ;;  %s1110_s8 = int_to_ptr.vmem [resolvable:$true] %s1109_s8 }
  0x2a   :  { %215 = vmatpush1.bf16.msra.mxu0 %v1645_v6  ;;  %v1657_v10 = vld [vmem:[#allocation6 + $0x30] ss:$12 sps:$4 sm:$0xff]   ;;  %v1660_v11 = vld [vmem:[#allocation6 + $0x4c] ss:$12 sps:$4 sm:$0xff]   ;;  %v1662_v12 = vld [vmem:[#allocation6 + $0x8] ss:$12 sps:$4 sm:$0xff]   ;;  %p1566_p3 = scmp.lt.s32.totalorder %s1110_s8, %s1110_s8 }
  0x2b   :  { %vm47_vm1 = vcmp.eq.s32.totalorder %v46_v3, 32  ;;  %216 = vmatprep.subr.bf16.mxu0 %v1648_v7  ;;  %v1665_v13 = vld [vmem:[#allocation6 + $0x48] ss:$12 sps:$4 sm:$0xff]   ;;  %v1668_v14 = vld [vmem:[#allocation6 + $0x64] ss:$12 sps:$4 sm:$0xff]   ;;  %1232 = vmatpush3.bf16.msra.mxu1 %v1662_v12  ;;  %s1561_s9 = scalar_lea.vmem %s1110_s8, 32 }
  0x2c   :  { %v48_v4 = vsel %vm47_vm1, 1.0, %v1595_v1  ;;  %v1671_v15 = vld [vmem:[#allocation6 + $0x20] ss:$12 sps:$4 sm:$0xff]   ;;  %1233 = vmatprep.subr.bf16.mxu1 %v1595_v1  ;;  %v1677_v17 = vld [vmem:[#allocation6 + $0x7c] ss:$12 sps:$4 sm:$0xff]   ;;  %p1562_p2 = scmp.ne.s32.totalorder %s1110_s8, %s1561_s9  ;;  %p1567_p4 = scmp.lt.s32.totalorder %s1561_s9, %s1561_s9 }
  0x2d   :  { %49 = vst [vmem:[#allocation2] sm:$0x3] %v48_v4  ;;  %v1674_v16 = vld [vmem:[#allocation6 + $0x60] ss:$12 sps:$4 sm:$0xff]   ;;  %v1681_v18 = vld [vmem:[#allocation6 + $0x38] ss:$12 sps:$4 sm:$0xff]  }
  0x2e   :  { %217 = vmatpush1.bf16.msra.mxu0 %v1651_v8  ;;  %v1685_v19 = vld [vmem:[#allocation6 + $0x78] ss:$12 sps:$4 sm:$0xff]   ;;  %v1688_v20 = vld [vmem:[#allocation6 + $0x94] ss:$12 sps:$4 sm:$0xff]   ;;  %v1691_v21 = vld [vmem:[#allocation6 + $0x50] ss:$12 sps:$4 sm:$0xff]   ;;  %p1568_p5 = por %p1567_p4, %p1566_p3 }
  0x2f   :  { %218 = vmatprep.subr.bf16.mxu0 %v1654_v9  ;;  %1234 = vmatpush3.bf16.msra.mxu1 %v1671_v15  ;;  %v1695_v22 = vld [vmem:[#allocation6 + $0x90] ss:$12 sps:$4 sm:$0xff]   ;;  %v1698_v23 = vld [vmem:[#allocation6 + $0xac] ss:$12 sps:$4 sm:$0xff]   ;;  %v1701_v24 = vld [vmem:[#allocation6 + $0x68] ss:$12 sps:$4 sm:$0xff]  }
  0x30   :  { %1235 = vmatprep.subr.bf16.mxu1 %v1595_v1  ;;  %v1705_v25 = vld [vmem:[#allocation6 + $0xa8] ss:$12 sps:$4 sm:$0xff]   ;;  %v1711_v27 = vld [vmem:[#allocation6 + $0x80] ss:$12 sps:$4 sm:$0xff]   ;;  %v1718_v29 = vld [vmem:[#allocation6 + $0x98] ss:$12 sps:$4 sm:$0xff]   ;;  %p1569_p6 = pnand %p1568_p5, %p1562_p2 }
  0x31   :  { %v1725_v30 = vld [vmem:[#allocation6 + $0xb0] ss:$12 sps:$4 sm:$0xff]   ;;  %v83_v31 = vld [vmem:[#allocation3] sm:$0x7]  ;;  %v322_v61 = vld [vmem:[#allocation3 + $0x3] sm:$0x7] }
  0x32   :  { %219 = vmatpush1.bf16.msra.mxu0 %v1657_v10  ;;  %v84_v32 = vunpack.c.l.bf16 %v83_v31  ;;  %v323_v62 = vunpack.c.l.bf16 %v322_v61 }
  0x33   :  { %220 = vmatprep.subr.bf16.mxu0 %v1660_v11  ;;  %1236 = vmatpush3.bf16.msra.mxu1 %v1681_v18 }
  0x34   :  { %1237 = vmatprep.subr.bf16.mxu1 %v1595_v1  ;;  %v1707_v26 = vld [vmem:[#allocation2] sm:$0x3]  ;;  %v303_v34 = vrot.slane %v84_v32, 2  ;;  %v313_v50 = vrot.slane %v84_v32, 4  ;;  %v414_v3 = vrot.slane %v323_v62, 2 }
  0x35   :  { %v85_v28 = vpack.c.bf16 %v1707_v26, %v1707_v26 }
  0x36   :  { %221 = vmatpush1.bf16.msra.mxu0 %v1665_v13 }
  0x37   :  { %222 = vmatprep.subr.bf16.mxu0 %v1668_v14  ;;  %1238 = vmatpush3.bf16.msra.mxu1 %v1691_v21 }
  0x38   :  { %1239 = vmatprep.subr.bf16.mxu1 %v1595_v1 }
  0x3a   :  { %223 = vmatpush1.bf16.msra.mxu0 %v1674_v16 }
  0x3b   :  { %224 = vmatprep.subr.bf16.mxu0 %v1677_v17  ;;  %1240 = vmatpush3.bf16.msra.mxu1 %v1701_v24 }
  0x3c   :  { %1241 = vmatprep.subr.bf16.mxu1 %v1595_v1 }
  0x3e   :  { %225 = vmatpush1.bf16.msra.mxu0 %v1685_v19 }
  0x3f   :  { %226 = vmatprep.subr.bf16.mxu0 %v1688_v20  ;;  %1242 = vmatpush3.bf16.msra.mxu1 %v1711_v27 }
  0x40   :  { %1243 = vmatprep.subr.bf16.mxu1 %v1595_v1 }
  0x42   :  { %227 = vmatpush1.bf16.msra.mxu0 %v1695_v22 }
  0x43   :  { %228 = vmatprep.subr.bf16.mxu0 %v1698_v23  ;;  %1244 = vmatpush3.bf16.msra.mxu1 %v1718_v29 }
  0x44   :  { %1245 = vmatprep.subr.bf16.mxu1 %v1595_v1 }
  0x46   :  { %229 = vmatpush1.bf16.msra.mxu0 %v1705_v25 }
  0x47   :  { %325 = vmatprep.subr.bf16.mxu0 %v1643_v5  ;;  %1246 = vmatpush3.bf16.msra.mxu1 %v1725_v30 }
  0x48   :  { %1251 = vmatprep.subr.bf16.mxu1 %v1595_v1 }
  0x49   :  { %247 = vmatmul.mubr.bf16.vlgmr.msra.gmra.mrb[0].mxu0 %v85_v28 }
  0x4a   :  { %326 = vmatpush1.bf16.msra.mxu0 %v1645_v6  ;;  %357 = vmatprep.mubr.bf16.mxu0 %v1596_v2 }
  0x4b   :  { %327 = vmatprep.subr.bf16.mxu0 %v1648_v7  ;;  %1248 = vmatmul.mubr.bf16.vlgmr.msra.gmra.mrb[0].mxu1 %v85_v28 }
  0x4c   :  { %1252 = vmatpush3.bf16.msra.mxu1 %v1662_v12  ;;  %1267 = vmatprep.mubr.msk.bf16.mxu1 %vm1597_vm0, %v1595_v1 }
  0x4d   :  { %1253 = vmatprep.subr.bf16.mxu1 %v1595_v1 }
  0x4e   :  { %328 = vmatpush1.bf16.msra.mxu0 %v1651_v8 }
  0x4f   :  { %329 = vmatprep.subr.bf16.mxu0 %v1654_v9 }
  0x50   :  { %1254 = vmatpush3.bf16.msra.mxu1 %v1671_v15 }
  0x51   :  { %1255 = vmatprep.subr.bf16.mxu1 %v1595_v1 }
  0x52   :  { %330 = vmatpush1.bf16.msra.mxu0 %v1657_v10 }
  0x53   :  { %331 = vmatprep.subr.bf16.mxu0 %v1660_v11 }
  0x54   :  { %1256 = vmatpush3.bf16.msra.mxu1 %v1681_v18 }
  0x55   :  { %1257 = vmatprep.subr.bf16.mxu1 %v1595_v1 }
  0x56   :  { %332 = vmatpush1.bf16.msra.mxu0 %v1665_v13 }
  0x57   :  { %333 = vmatprep.subr.bf16.mxu0 %v1668_v14 }
  0x58   :  { %1258 = vmatpush3.bf16.msra.mxu1 %v1691_v21 }
  0x59   :  { %1259 = vmatprep.subr.bf16.mxu1 %v1595_v1 }
  0x5a   :  { %334 = vmatpush1.bf16.msra.mxu0 %v1674_v16 }
  0x5b   :  { %335 = vmatprep.subr.bf16.mxu0 %v1677_v17 }
  0x5c   :  { %1260 = vmatpush3.bf16.msra.mxu1 %v1701_v24 }
  0x5d   :  { %1261 = vmatprep.subr.bf16.mxu1 %v1595_v1 }
  0x5e   :  { %336 = vmatpush1.bf16.msra.mxu0 %v1685_v19 }
  0x5f   :  { %337 = vmatprep.subr.bf16.mxu0 %v1688_v20 }
  0x60   :  { %1262 = vmatpush3.bf16.msra.mxu1 %v1711_v27 }
  0x61   :  { %1263 = vmatprep.subr.bf16.mxu1 %v1595_v1 }
  0x62   :  { %338 = vmatpush1.bf16.msra.mxu0 %v1695_v22 }
  0x63   :  { %339 = vmatprep.subr.bf16.mxu0 %v1698_v23 }
  0x64   :  { %1264 = vmatpush3.bf16.msra.mxu1 %v1718_v29 }
  0x65   :  { %1265 = vmatprep.subr.bf16.mxu1 %v1595_v1 }
  0x66   :  { %340 = vmatpush1.bf16.msra.mxu0 %v1705_v25 }
  0x67   :  { %436 = vmatprep.subr.bf16.mxu0 %v1643_v5 }
  0x68   :  { %1266 = vmatpush3.bf16.msra.mxu1 %v1725_v30 }
  0x69   :  { %1271 = vmatprep.subr.bf16.mxu1 %v1595_v1 }
 0x11c   :  { %v248_v33 = vpop.f32.mrb[0].mxu0 }
 0x11d   :  { %v295_v35 = vadd.f32 %v248_v33, %v84_v32  ;;  %v250_v36 = vpop.f32.mrb[1].mxu0 }
 0x11e   :  { %v252_v37 = vpop.f32.mrb[2].mxu0  ;;  %v305_v40 = vadd.f32 %v303_v34, %v250_v36  ;;  %v289_v42 = vpop.f32.mrb[0].mxu1 }
 0x11f   :  { %v1143_v38 = vmul.f32 -1.442695, %v295_v35  ;;  %v253_v39 = vpop.f32.mrb[3].mxu0  ;;  %v1249_v43 = vpop.f32.mrb[1].mxu1 }
 0x120   :  { %v1144_v41 = vmul.f32 -1.442695, %v305_v40  ;;  %v292_v44 = vpop.f32.mrb[2].mxu1 }
 0x121   :  { %1433 = vpow2.f32 %v1143_v38  ;;  %v1250_v45 = vpop.f32.mrb[3].mxu1 }
 0x122   :  { %1435 = vpow2.f32 %v1144_v41 }
 0x12b   :  { %v1434_v46 = vpop.eup %1433 }
 0x12c   :  { %v299_v47 = vadd.f32 1.0, %v1434_v46  ;;  %v1436_v48 = vpop.eup %1435 }
 0x12d   :  { %v309_v49 = vadd.f32 1.0, %v1436_v48 }
 0x12e   :  { %1437 = vrcp.f32 %v299_v47 }
 0x12f   :  { %1439 = vrcp.f32 %v309_v49 }
 0x138   :  { %v1438_v51 = vpop.eup %1437 }
 0x139   :  { %v312_v52 = vmul.f32 %v1438_v51, %v289_v42  ;;  %v1440_v54 = vpop.eup %1439  ;;  %v424_v42 = vrot.slane %v323_v62, 4 }
 0x13a   :  { %v317_v55 = vsub.f32 1.0, %v1440_v54  ;;  %v319_v58 = vmul.f32 %v1440_v54, %v1707_v26 }
 0x13b   :  { %v315_v53 = vadd.f32 %v313_v50, %v312_v52 }
 0x13d   :  { %1441 = vtanh.f32 %v315_v53  ;;  %v433_v53 = vld [vmem:[#allocation3 + $0x6] sm:$0x7] }
 0x13e   :  { %v434_v54 = vunpack.c.l.bf16 %v433_v53 }
 0x147   :  { %v1442_v56 = vpop.eup %1441 }
 0x148   :  { %v318_v57 = vmul.f32 %v1442_v56, %v317_v55 }
 0x14a   :  { %v1764_v59 = vadd.f32 %v319_v58, %v318_v57  ;;  %v525_v57 = vrot.slane %v434_v54, 2 }
 0x14c   :  { %v324_v60 = vpack.c.bf16 %v1764_v59, %v1764_v59 }
 0x14e   :  { %358 = vmatmul.mubr.bf16.vlgmr.msra.gmra.mrb[4].mxu0 %v324_v60  ;;  %1268 = vmatmul.mubr.bf16.vlgmr.msra.gmra.mrb[4].mxu1 %v324_v60 }
 0x14f   :  { %437 = vmatpush1.bf16.msra.mxu0 %v1645_v6  ;;  %1272 = vmatpush3.bf16.msra.mxu1 %v1662_v12 }
 0x150   :  { %438 = vmatprep.subr.bf16.mxu0 %v1648_v7  ;;  %1273 = vmatprep.subr.bf16.mxu1 %v1595_v1 }
 0x151   :  { %468 = vmatprep.mubr.bf16.mxu0 %v1596_v2  ;;  %1287 = vmatprep.mubr.msk.bf16.mxu1 %vm1597_vm0, %v1595_v1 }
 0x153   :  { %439 = vmatpush1.bf16.msra.mxu0 %v1651_v8  ;;  %1274 = vmatpush3.bf16.msra.mxu1 %v1671_v15 }
 0x154   :  { %440 = vmatprep.subr.bf16.mxu0 %v1654_v9  ;;  %1275 = vmatprep.subr.bf16.mxu1 %v1595_v1 }
 0x157   :  { %441 = vmatpush1.bf16.msra.mxu0 %v1657_v10  ;;  %1276 = vmatpush3.bf16.msra.mxu1 %v1681_v18 }
 0x158   :  { %442 = vmatprep.subr.bf16.mxu0 %v1660_v11  ;;  %1277 = vmatprep.subr.bf16.mxu1 %v1595_v1 }
 0x15b   :  { %443 = vmatpush1.bf16.msra.mxu0 %v1665_v13  ;;  %1278 = vmatpush3.bf16.msra.mxu1 %v1691_v21 }
 0x15c   :  { %444 = vmatprep.subr.bf16.mxu0 %v1668_v14  ;;  %1279 = vmatprep.subr.bf16.mxu1 %v1595_v1 }
 0x15f   :  { %445 = vmatpush1.bf16.msra.mxu0 %v1674_v16  ;;  %1280 = vmatpush3.bf16.msra.mxu1 %v1701_v24 }
 0x160   :  { %446 = vmatprep.subr.bf16.mxu0 %v1677_v17  ;;  %1281 = vmatprep.subr.bf16.mxu1 %v1595_v1 }
 0x163   :  { %447 = vmatpush1.bf16.msra.mxu0 %v1685_v19  ;;  %1282 = vmatpush3.bf16.msra.mxu1 %v1711_v27 }
 0x164   :  { %448 = vmatprep.subr.bf16.mxu0 %v1688_v20  ;;  %1283 = vmatprep.subr.bf16.mxu1 %v1595_v1 }
 0x167   :  { %449 = vmatpush1.bf16.msra.mxu0 %v1695_v22  ;;  %1284 = vmatpush3.bf16.msra.mxu1 %v1718_v29 }
 0x168   :  { %450 = vmatprep.subr.bf16.mxu0 %v1698_v23  ;;  %1285 = vmatprep.subr.bf16.mxu1 %v1595_v1 }
 0x16b   :  { %451 = vmatpush1.bf16.msra.mxu0 %v1705_v25  ;;  %1286 = vmatpush3.bf16.msra.mxu1 %v1725_v30 }
 0x16c   :  { %547 = vmatprep.subr.bf16.mxu0 %v1643_v5  ;;  %1291 = vmatprep.subr.bf16.mxu1 %v1595_v1 }
 0x221   :  { %v359_v63 = vpop.f32.mrb[4].mxu0  ;;  %v400_v0 = vpop.f32.mrb[4].mxu1 }
 0x222   :  { %v406_v4 = vadd.f32 %v359_v63, %v323_v62  ;;  %v361_v26 = vpop.f32.mrb[5].mxu0  ;;  %v1269_v28 = vpop.f32.mrb[5].mxu1 }
 0x223   :  { %v363_v31 = vpop.f32.mrb[6].mxu0  ;;  %v403_v32 = vpop.f32.mrb[6].mxu1  ;;  %v416_v36 = vadd.f32 %v414_v3, %v361_v26 }
 0x224   :  { %v1145_v33 = vmul.f32 -1.442695, %v406_v4  ;;  %v364_v34 = vpop.f32.mrb[7].mxu0  ;;  %v1270_v35 = vpop.f32.mrb[7].mxu1 }
 0x225   :  { %v1146_v37 = vmul.f32 -1.442695, %v416_v36  ;;  %v535_v34 = vrot.slane %v434_v54, 4 }
 0x226   :  { %1443 = vpow2.f32 %v1145_v33 }
 0x227   :  { %1445 = vpow2.f32 %v1146_v37 }
 0x230   :  { %v1444_v38 = vpop.eup %1443 }
 0x231   :  { %v410_v39 = vadd.f32 1.0, %v1444_v38  ;;  %v1446_v40 = vpop.eup %1445 }
 0x232   :  { %v420_v41 = vadd.f32 1.0, %v1446_v40 }
 0x233   :  { %1447 = vrcp.f32 %v410_v39 }
 0x234   :  { %1449 = vrcp.f32 %v420_v41 }
 0x23d   :  { %v1448_v43 = vpop.eup %1447 }
 0x23e   :  { %v423_v44 = vmul.f32 %v1448_v43, %v400_v0  ;;  %v1450_v46 = vpop.eup %1449 }
 0x23f   :  { %v428_v47 = vsub.f32 1.0, %v1450_v46  ;;  %v430_v50 = vmul.f32 %v1450_v46, %v1764_v59 }
 0x240   :  { %v426_v45 = vadd.f32 %v424_v42, %v423_v44 }
 0x242   :  { %1451 = vtanh.f32 %v426_v45  ;;  %v544_v45 = vld [vmem:[#allocation3 + $0x9] sm:$0x7] }
 0x243   :  { %v545_v46 = vunpack.c.l.bf16 %v544_v45 }
 0x24c   :  { %v1452_v48 = vpop.eup %1451 }
 0x24d   :  { %v429_v49 = vmul.f32 %v1452_v48, %v428_v47 }
 0x24f   :  { %v1804_v51 = vadd.f32 %v430_v50, %v429_v49  ;;  %v636_v49 = vrot.slane %v545_v46, 2 }
 0x251   :  { %v435_v52 = vpack.c.bf16 %v1804_v51, %v1804_v51 }
 0x253   :  { %469 = vmatmul.mubr.bf16.vlgmr.msra.gmra.mrb[8].mxu0 %v435_v52  ;;  %1288 = vmatmul.mubr.bf16.vlgmr.msra.gmra.mrb[8].mxu1 %v435_v52 }
 0x254   :  { %548 = vmatpush1.bf16.msra.mxu0 %v1645_v6  ;;  %1292 = vmatpush3.bf16.msra.mxu1 %v1662_v12 }
 0x255   :  { %549 = vmatprep.subr.bf16.mxu0 %v1648_v7  ;;  %1293 = vmatprep.subr.bf16.mxu1 %v1595_v1 }
 0x256   :  { %579 = vmatprep.mubr.bf16.mxu0 %v1596_v2  ;;  %1307 = vmatprep.mubr.msk.bf16.mxu1 %vm1597_vm0, %v1595_v1 }
 0x258   :  { %550 = vmatpush1.bf16.msra.mxu0 %v1651_v8  ;;  %1294 = vmatpush3.bf16.msra.mxu1 %v1671_v15 }
 0x259   :  { %551 = vmatprep.subr.bf16.mxu0 %v1654_v9  ;;  %1295 = vmatprep.subr.bf16.mxu1 %v1595_v1 }
 0x25c   :  { %552 = vmatpush1.bf16.msra.mxu0 %v1657_v10  ;;  %1296 = vmatpush3.bf16.msra.mxu1 %v1681_v18 }
 0x25d   :  { %553 = vmatprep.subr.bf16.mxu0 %v1660_v11  ;;  %1297 = vmatprep.subr.bf16.mxu1 %v1595_v1 }
 0x260   :  { %554 = vmatpush1.bf16.msra.mxu0 %v1665_v13  ;;  %1298 = vmatpush3.bf16.msra.mxu1 %v1691_v21 }
 0x261   :  { %555 = vmatprep.subr.bf16.mxu0 %v1668_v14  ;;  %1299 = vmatprep.subr.bf16.mxu1 %v1595_v1 }
 0x264   :  { %556 = vmatpush1.bf16.msra.mxu0 %v1674_v16  ;;  %1300 = vmatpush3.bf16.msra.mxu1 %v1701_v24 }
 0x265   :  { %557 = vmatprep.subr.bf16.mxu0 %v1677_v17  ;;  %1301 = vmatprep.subr.bf16.mxu1 %v1595_v1 }
 0x268   :  { %558 = vmatpush1.bf16.msra.mxu0 %v1685_v19  ;;  %1302 = vmatpush3.bf16.msra.mxu1 %v1711_v27 }
 0x269   :  { %559 = vmatprep.subr.bf16.mxu0 %v1688_v20  ;;  %1303 = vmatprep.subr.bf16.mxu1 %v1595_v1 }
 0x26c   :  { %560 = vmatpush1.bf16.msra.mxu0 %v1695_v22  ;;  %1304 = vmatpush3.bf16.msra.mxu1 %v1718_v29 }
 0x26d   :  { %561 = vmatprep.subr.bf16.mxu0 %v1698_v23  ;;  %1305 = vmatprep.subr.bf16.mxu1 %v1595_v1 }
 0x270   :  { %562 = vmatpush1.bf16.msra.mxu0 %v1705_v25  ;;  %1306 = vmatpush3.bf16.msra.mxu1 %v1725_v30 }
 0x271   :  { %658 = vmatprep.subr.bf16.mxu0 %v1643_v5  ;;  %1311 = vmatprep.subr.bf16.mxu1 %v1595_v1 }
 0x326   :  { %v470_v55 = vpop.f32.mrb[8].mxu0  ;;  %v511_v56 = vpop.f32.mrb[8].mxu1 }
 0x327   :  { %v517_v58 = vadd.f32 %v470_v55, %v434_v54  ;;  %v472_v59 = vpop.f32.mrb[9].mxu0  ;;  %v1289_v60 = vpop.f32.mrb[9].mxu1 }
 0x328   :  { %v474_v61 = vpop.f32.mrb[10].mxu0  ;;  %v514_v62 = vpop.f32.mrb[10].mxu1  ;;  %v527_v4 = vadd.f32 %v525_v57, %v472_v59 }
 0x329   :  { %v1147_v63 = vmul.f32 -1.442695, %v517_v58  ;;  %v475_v0 = vpop.f32.mrb[11].mxu0  ;;  %v1290_v3 = vpop.f32.mrb[11].mxu1 }
 0x32a   :  { %v1148_v26 = vmul.f32 -1.442695, %v527_v4  ;;  %v646_v0 = vrot.slane %v545_v46, 4 }
 0x32b   :  { %1453 = vpow2.f32 %v1147_v63 }
 0x32c   :  { %1455 = vpow2.f32 %v1148_v26 }
 0x335   :  { %v1454_v28 = vpop.eup %1453 }
 0x336   :  { %v521_v31 = vadd.f32 1.0, %v1454_v28  ;;  %v1456_v32 = vpop.eup %1455 }
 0x337   :  { %v531_v33 = vadd.f32 1.0, %v1456_v32 }
 0x338   :  { %1457 = vrcp.f32 %v521_v31 }
 0x339   :  { %1459 = vrcp.f32 %v531_v33 }
 0x342   :  { %v1458_v35 = vpop.eup %1457 }
 0x343   :  { %v534_v36 = vmul.f32 %v1458_v35, %v511_v56  ;;  %v1460_v38 = vpop.eup %1459 }
 0x344   :  { %v539_v39 = vsub.f32 1.0, %v1460_v38  ;;  %v541_v42 = vmul.f32 %v1460_v38, %v1804_v51 }
 0x345   :  { %v537_v37 = vadd.f32 %v535_v34, %v534_v36 }
 0x347   :  { %1461 = vtanh.f32 %v537_v37  ;;  %v655_v37 = vld [vmem:[#allocation3 + $0xc] sm:$0x7] }
 0x348   :  { %v656_v38 = vunpack.c.l.bf16 %v655_v37 }
 0x351   :  { %v1462_v40 = vpop.eup %1461 }
 0x352   :  { %v540_v41 = vmul.f32 %v1462_v40, %v539_v39 }
 0x354   :  { %v1844_v43 = vadd.f32 %v541_v42, %v540_v41  ;;  %v747_v41 = vrot.slane %v656_v38, 2 }
 0x356   :  { %v546_v44 = vpack.c.bf16 %v1844_v43, %v1844_v43 }
 0x358   :  { %580 = vmatmul.mubr.bf16.vlgmr.msra.gmra.mrb[12].mxu0 %v546_v44  ;;  %1308 = vmatmul.mubr.bf16.vlgmr.msra.gmra.mrb[12].mxu1 %v546_v44 }
 0x359   :  { %659 = vmatpush1.bf16.msra.mxu0 %v1645_v6  ;;  %1312 = vmatpush3.bf16.msra.mxu1 %v1662_v12 }
 0x35a   :  { %660 = vmatprep.subr.bf16.mxu0 %v1648_v7  ;;  %1313 = vmatprep.subr.bf16.mxu1 %v1595_v1 }
 0x35b   :  { %690 = vmatprep.mubr.bf16.mxu0 %v1596_v2  ;;  %1327 = vmatprep.mubr.msk.bf16.mxu1 %vm1597_vm0, %v1595_v1 }
 0x35d   :  { %661 = vmatpush1.bf16.msra.mxu0 %v1651_v8  ;;  %1314 = vmatpush3.bf16.msra.mxu1 %v1671_v15 }
 0x35e   :  { %662 = vmatprep.subr.bf16.mxu0 %v1654_v9  ;;  %1315 = vmatprep.subr.bf16.mxu1 %v1595_v1 }
 0x361   :  { %663 = vmatpush1.bf16.msra.mxu0 %v1657_v10  ;;  %1316 = vmatpush3.bf16.msra.mxu1 %v1681_v18 }
 0x362   :  { %664 = vmatprep.subr.bf16.mxu0 %v1660_v11  ;;  %1317 = vmatprep.subr.bf16.mxu1 %v1595_v1 }
 0x365   :  { %665 = vmatpush1.bf16.msra.mxu0 %v1665_v13  ;;  %1318 = vmatpush3.bf16.msra.mxu1 %v1691_v21 }
 0x366   :  { %666 = vmatprep.subr.bf16.mxu0 %v1668_v14  ;;  %1319 = vmatprep.subr.bf16.mxu1 %v1595_v1 }
 0x369   :  { %667 = vmatpush1.bf16.msra.mxu0 %v1674_v16  ;;  %1320 = vmatpush3.bf16.msra.mxu1 %v1701_v24 }
 0x36a   :  { %668 = vmatprep.subr.bf16.mxu0 %v1677_v17  ;;  %1321 = vmatprep.subr.bf16.mxu1 %v1595_v1 }
 0x36d   :  { %669 = vmatpush1.bf16.msra.mxu0 %v1685_v19  ;;  %1322 = vmatpush3.bf16.msra.mxu1 %v1711_v27 }
 0x36e   :  { %670 = vmatprep.subr.bf16.mxu0 %v1688_v20  ;;  %1323 = vmatprep.subr.bf16.mxu1 %v1595_v1 }
 0x371   :  { %671 = vmatpush1.bf16.msra.mxu0 %v1695_v22  ;;  %1324 = vmatpush3.bf16.msra.mxu1 %v1718_v29 }
 0x372   :  { %672 = vmatprep.subr.bf16.mxu0 %v1698_v23  ;;  %1325 = vmatprep.subr.bf16.mxu1 %v1595_v1 }
 0x375   :  { %673 = vmatpush1.bf16.msra.mxu0 %v1705_v25  ;;  %1326 = vmatpush3.bf16.msra.mxu1 %v1725_v30 }
 0x376   :  { %769 = vmatprep.subr.bf16.mxu0 %v1643_v5  ;;  %1331 = vmatprep.subr.bf16.mxu1 %v1595_v1 }
 0x42b   :  { %v581_v47 = vpop.f32.mrb[12].mxu0  ;;  %v622_v48 = vpop.f32.mrb[12].mxu1 }
 0x42c   :  { %v628_v50 = vadd.f32 %v581_v47, %v545_v46  ;;  %v583_v51 = vpop.f32.mrb[13].mxu0  ;;  %v1309_v52 = vpop.f32.mrb[13].mxu1 }
 0x42d   :  { %v585_v53 = vpop.f32.mrb[14].mxu0  ;;  %v625_v54 = vpop.f32.mrb[14].mxu1  ;;  %v638_v58 = vadd.f32 %v636_v49, %v583_v51 }
 0x42e   :  { %v1149_v55 = vmul.f32 -1.442695, %v628_v50  ;;  %v586_v56 = vpop.f32.mrb[15].mxu0  ;;  %v1310_v57 = vpop.f32.mrb[15].mxu1 }
 0x42f   :  { %v1150_v59 = vmul.f32 -1.442695, %v638_v58  ;;  %v757_v56 = vrot.slane %v656_v38, 4 }
 0x430   :  { %1463 = vpow2.f32 %v1149_v55 }
 0x431   :  { %1465 = vpow2.f32 %v1150_v59 }
 0x43a   :  { %v1464_v60 = vpop.eup %1463 }
 0x43b   :  { %v632_v61 = vadd.f32 1.0, %v1464_v60  ;;  %v1466_v62 = vpop.eup %1465 }
 0x43c   :  { %v642_v63 = vadd.f32 1.0, %v1466_v62 }
 0x43d   :  { %1467 = vrcp.f32 %v632_v61 }
 0x43e   :  { %1469 = vrcp.f32 %v642_v63 }
 0x447   :  { %v1468_v3 = vpop.eup %1467 }
 0x448   :  { %v645_v4 = vmul.f32 %v1468_v3, %v622_v48  ;;  %v1470_v28 = vpop.eup %1469 }
 0x449   :  { %v650_v31 = vsub.f32 1.0, %v1470_v28  ;;  %v652_v34 = vmul.f32 %v1470_v28, %v1844_v43 }
 0x44a   :  { %v648_v26 = vadd.f32 %v646_v0, %v645_v4 }
 0x44c   :  { %1471 = vtanh.f32 %v648_v26 }
 0x456   :  { %v1472_v32 = vpop.eup %1471 }
 0x457   :  { %v651_v33 = vmul.f32 %v1472_v32, %v650_v31 }
 0x459   :  { %v1884_v35 = vadd.f32 %v652_v34, %v651_v33 }
 0x45b   :  { %v657_v36 = vpack.c.bf16 %v1884_v35, %v1884_v35 }
 0x45d   :  { %691 = vmatmul.mubr.bf16.vlgmr.msra.gmra.mrb[16].mxu0 %v657_v36  ;;  %1328 = vmatmul.mubr.bf16.vlgmr.msra.gmra.mrb[16].mxu1 %v657_v36 }
 0x45e   :  { %770 = vmatpush1.bf16.msra.mxu0 %v1645_v6  ;;  %1332 = vmatpush3.bf16.msra.mxu1 %v1662_v12 }
 0x45f   :  { %771 = vmatprep.subr.bf16.mxu0 %v1648_v7  ;;  %1333 = vmatprep.subr.bf16.mxu1 %v1595_v1 }
 0x460   :  { %801 = vmatprep.mubr.bf16.mxu0 %v1596_v2  ;;  %1347 = vmatprep.mubr.msk.bf16.mxu1 %vm1597_vm0, %v1595_v1 }
 0x462   :  { %772 = vmatpush1.bf16.msra.mxu0 %v1651_v8  ;;  %1334 = vmatpush3.bf16.msra.mxu1 %v1671_v15 }
 0x463   :  { %773 = vmatprep.subr.bf16.mxu0 %v1654_v9  ;;  %1335 = vmatprep.subr.bf16.mxu1 %v1595_v1 }
 0x466   :  { %774 = vmatpush1.bf16.msra.mxu0 %v1657_v10  ;;  %1336 = vmatpush3.bf16.msra.mxu1 %v1681_v18 }
 0x467   :  { %775 = vmatprep.subr.bf16.mxu0 %v1660_v11  ;;  %1337 = vmatprep.subr.bf16.mxu1 %v1595_v1 }
 0x46a   :  { %776 = vmatpush1.bf16.msra.mxu0 %v1665_v13  ;;  %1338 = vmatpush3.bf16.msra.mxu1 %v1691_v21 }
 0x46b   :  { %777 = vmatprep.subr.bf16.mxu0 %v1668_v14  ;;  %1339 = vmatprep.subr.bf16.mxu1 %v1595_v1 }
 0x46e   :  { %778 = vmatpush1.bf16.msra.mxu0 %v1674_v16  ;;  %1340 = vmatpush3.bf16.msra.mxu1 %v1701_v24 }
 0x46f   :  { %779 = vmatprep.subr.bf16.mxu0 %v1677_v17  ;;  %1341 = vmatprep.subr.bf16.mxu1 %v1595_v1 }
 0x472   :  { %780 = vmatpush1.bf16.msra.mxu0 %v1685_v19  ;;  %1342 = vmatpush3.bf16.msra.mxu1 %v1711_v27 }
 0x473   :  { %781 = vmatprep.subr.bf16.mxu0 %v1688_v20  ;;  %1343 = vmatprep.subr.bf16.mxu1 %v1595_v1 }
 0x476   :  { %782 = vmatpush1.bf16.msra.mxu0 %v1695_v22  ;;  %1344 = vmatpush3.bf16.msra.mxu1 %v1718_v29 }
 0x477   :  { %783 = vmatprep.subr.bf16.mxu0 %v1698_v23  ;;  %1345 = vmatprep.subr.bf16.mxu1 %v1595_v1 }
 0x47a   :  { %784 = vmatpush1.bf16.msra.mxu0 %v1705_v25  ;;  %1346 = vmatpush3.bf16.msra.mxu1 %v1725_v30 }
 0x47b   :  { %880 = vmatprep.subr.bf16.mxu0 %v1643_v5  ;;  %1351 = vmatprep.subr.bf16.mxu1 %v1595_v1 }
 0x530   :  { %v692_v39 = vpop.f32.mrb[16].mxu0  ;;  %v733_v40 = vpop.f32.mrb[16].mxu1 }
 0x531   :  { %v739_v42 = vadd.f32 %v692_v39, %v656_v38  ;;  %v694_v43 = vpop.f32.mrb[17].mxu0  ;;  %v1329_v44 = vpop.f32.mrb[17].mxu1 }
 0x532   :  { %v696_v45 = vpop.f32.mrb[18].mxu0  ;;  %v736_v46 = vpop.f32.mrb[18].mxu1  ;;  %v749_v50 = vadd.f32 %v747_v41, %v694_v43 }
 0x533   :  { %v1151_v47 = vmul.f32 -1.442695, %v739_v42  ;;  %v697_v48 = vpop.f32.mrb[19].mxu0  ;;  %v1330_v49 = vpop.f32.mrb[19].mxu1 }
 0x534   :  { %v1152_v51 = vmul.f32 -1.442695, %v749_v50 }
 0x535   :  { %1473 = vpow2.f32 %v1151_v47 }
 0x536   :  { %1475 = vpow2.f32 %v1152_v51 }
 0x53f   :  { %v1474_v52 = vpop.eup %1473 }
 0x540   :  { %v743_v53 = vadd.f32 1.0, %v1474_v52  ;;  %v1476_v54 = vpop.eup %1475 }
 0x541   :  { %v753_v55 = vadd.f32 1.0, %v1476_v54  ;;  %v1513_v54 = vld [vmem:[#allocation6] ss:$12 sps:$4 sm:$0xff]  }
 0x542   :  { %1477 = vrcp.f32 %v743_v53 }
 0x543   :  { %1479 = vrcp.f32 %v753_v55  ;;  %v1514_v55 = vld [vmem:[#allocation6 + $0x1c] ss:$12 sps:$4 sm:$0xff]  }
 0x54c   :  { %v1478_v57 = vpop.eup %1477 }
 0x54d   :  { %v756_v58 = vmul.f32 %v1478_v57, %v733_v40  ;;  %v1480_v60 = vpop.eup %1479  ;;  %v1516_v57 = vld [vmem:[#allocation6 + $0x34] ss:$12 sps:$4 sm:$0xff]  }
 0x54e   :  { %v761_v61 = vsub.f32 1.0, %v1480_v60  ;;  %v763_v0 = vmul.f32 %v1480_v60, %v1884_v35 }
 0x54f   :  { %v759_v59 = vadd.f32 %v757_v56, %v756_v58  ;;  %v1515_v56 = vld [vmem:[#allocation6 + $0x18] ss:$12 sps:$4 sm:$0xff]  }
 0x551   :  { %1481 = vtanh.f32 %v759_v59 }
 0x55b   :  { %v1482_v62 = vpop.eup %1481 }
 0x55c   :  { %v762_v63 = vmul.f32 %v1482_v62, %v761_v61 }
 0x55e   :  { %v1924_v3 = vadd.f32 %v763_v0, %v762_v63 }
 0x560   :  { %v768_v4 = vpack.c.bf16 %v1924_v3, %v1924_v3 }
 0x562   :  { %802 = vmatmul.mubr.bf16.vlgmr.msra.gmra.mrb[20].mxu0 %v768_v4  ;;  %1348 = vmatmul.mubr.bf16.vlgmr.msra.gmra.mrb[20].mxu1 %v768_v4 }
 0x563   :  { %881 = vmatpush1.bf16.msra.mxu0 %v1645_v6  ;;  %1352 = vmatpush3.bf16.msra.mxu1 %v1662_v12  ;;  %v766_v6 = vld [vmem:[#allocation3 + $0xf] sm:$0x7] }
 0x564   :  { %882 = vmatprep.subr.bf16.mxu0 %v1648_v7  ;;  %1353 = vmatprep.subr.bf16.mxu1 %v1595_v1  ;;  %v767_v7 = vunpack.c.l.bf16 %v766_v6  ;;  %v988_v6 = vld [vmem:[#allocation3 + $0x15] sm:$0x7] }
 0x565   :  { %912 = vmatprep.mubr.bf16.mxu0 %v1596_v2  ;;  %1367 = vmatprep.mubr.msk.bf16.mxu1 %vm1597_vm0, %v1595_v1 }
 0x566   :  { %v858_v26 = vrot.slane %v767_v7, 2  ;;  %v868_v43 = vrot.slane %v767_v7, 4 }
 0x567   :  { %883 = vmatpush1.bf16.msra.mxu0 %v1651_v8  ;;  %1354 = vmatpush3.bf16.msra.mxu1 %v1671_v15 }
 0x568   :  { %884 = vmatprep.subr.bf16.mxu0 %v1654_v9  ;;  %1355 = vmatprep.subr.bf16.mxu1 %v1595_v1 }
 0x56b   :  { %885 = vmatpush1.bf16.msra.mxu0 %v1657_v10  ;;  %1356 = vmatpush3.bf16.msra.mxu1 %v1681_v18 }
 0x56c   :  { %886 = vmatprep.subr.bf16.mxu0 %v1660_v11  ;;  %1357 = vmatprep.subr.bf16.mxu1 %v1595_v1 }
 0x56f   :  { %887 = vmatpush1.bf16.msra.mxu0 %v1665_v13  ;;  %1358 = vmatpush3.bf16.msra.mxu1 %v1691_v21 }
 0x570   :  { %888 = vmatprep.subr.bf16.mxu0 %v1668_v14  ;;  %1359 = vmatprep.subr.bf16.mxu1 %v1595_v1 }
 0x573   :  { %889 = vmatpush1.bf16.msra.mxu0 %v1674_v16  ;;  %1360 = vmatpush3.bf16.msra.mxu1 %v1701_v24 }
 0x574   :  { %890 = vmatprep.subr.bf16.mxu0 %v1677_v17  ;;  %1361 = vmatprep.subr.bf16.mxu1 %v1595_v1 }
 0x577   :  { %891 = vmatpush1.bf16.msra.mxu0 %v1685_v19  ;;  %1362 = vmatpush3.bf16.msra.mxu1 %v1711_v27 }
 0x578   :  { %892 = vmatprep.subr.bf16.mxu0 %v1688_v20  ;;  %1363 = vmatprep.subr.bf16.mxu1 %v1595_v1 }
 0x57b   :  { %893 = vmatpush1.bf16.msra.mxu0 %v1695_v22  ;;  %1364 = vmatpush3.bf16.msra.mxu1 %v1718_v29 }
 0x57c   :  { %894 = vmatprep.subr.bf16.mxu0 %v1698_v23  ;;  %1365 = vmatprep.subr.bf16.mxu1 %v1595_v1 }
 0x57f   :  { %895 = vmatpush1.bf16.msra.mxu0 %v1705_v25  ;;  %1366 = vmatpush3.bf16.msra.mxu1 %v1725_v30 }
 0x580   :  { %991 = vmatprep.subr.bf16.mxu0 %v1643_v5  ;;  %1371 = vmatprep.subr.bf16.mxu1 %v1595_v1 }
 0x635   :  { %v803_v8 = vpop.f32.mrb[20].mxu0  ;;  %v844_v9 = vpop.f32.mrb[20].mxu1 }
 0x636   :  { %v850_v28 = vadd.f32 %v803_v8, %v767_v7  ;;  %v805_v31 = vpop.f32.mrb[21].mxu0  ;;  %v1349_v32 = vpop.f32.mrb[21].mxu1  ;;  %v989_v7 = vunpack.c.l.bf16 %v988_v6 }
 0x637   :  { %v807_v33 = vpop.f32.mrb[22].mxu0  ;;  %v847_v34 = vpop.f32.mrb[22].mxu1  ;;  %v860_v38 = vadd.f32 %v858_v26, %v805_v31 }
 0x638   :  { %v1153_v35 = vmul.f32 -1.442695, %v850_v28  ;;  %v808_v36 = vpop.f32.mrb[23].mxu0  ;;  %v1350_v37 = vpop.f32.mrb[23].mxu1  ;;  %v1080_v26 = vrot.slane %v989_v7, 2 }
 0x639   :  { %v1154_v39 = vmul.f32 -1.442695, %v860_v38 }
 0x63a   :  { %1483 = vpow2.f32 %v1153_v35 }
 0x63b   :  { %1485 = vpow2.f32 %v1154_v39 }
 0x644   :  { %v1484_v5 = vpop.eup %1483 }
 0x645   :  { %v854_v40 = vadd.f32 1.0, %v1484_v5  ;;  %v1486_v41 = vpop.eup %1485 }
 0x646   :  { %v864_v42 = vadd.f32 1.0, %v1486_v41 }
 0x647   :  { %1487 = vrcp.f32 %v854_v40 }
 0x648   :  { %1489 = vrcp.f32 %v864_v42 }
 0x651   :  { %v1488_v44 = vpop.eup %1487 }
 0x652   :  { %v867_v45 = vmul.f32 %v1488_v44, %v844_v9  ;;  %v1490_v47 = vpop.eup %1489 }
 0x653   :  { %v872_v48 = vsub.f32 1.0, %v1490_v47  ;;  %v874_v51 = vmul.f32 %v1490_v47, %v1924_v3 }
 0x654   :  { %v870_v46 = vadd.f32 %v868_v43, %v867_v45  ;;  %v1090_v43 = vrot.slane %v989_v7, 4 }
 0x656   :  { %1491 = vtanh.f32 %v870_v46 }
 0x660   :  { %v1492_v49 = vpop.eup %1491 }
 0x661   :  { %v873_v50 = vmul.f32 %v1492_v49, %v872_v48 }
 0x663   :  { %v1964_v52 = vadd.f32 %v874_v51, %v873_v50 }
 0x665   :  { %v879_v53 = vpack.c.bf16 %v1964_v52, %v1964_v52 }
 0x667   :  { %913 = vmatmul.mubr.bf16.vlgmr.msra.gmra.mrb[24].mxu0 %v879_v53  ;;  %1368 = vmatmul.mubr.bf16.vlgmr.msra.gmra.mrb[24].mxu1 %v879_v53 }
 0x668   :  { %992 = vmatpush1.bf16.msra.mxu0 %v1513_v54  ;;  %1372 = vmatpush3.bf16.msra.mxu1 %v1662_v12 }
 0x669   :  { %993 = vmatprep.subr.bf16.mxu0 %v1514_v55  ;;  %1373 = vmatprep.subr.bf16.mxu1 %v1595_v1 }
 0x66a   :  { %1023 = vmatprep.mubr.bf16.mxu0 %v1596_v2  ;;  %1387 = vmatprep.mubr.msk.bf16.mxu1 %vm1597_vm0, %v1595_v1  ;;  %v877_v2 = vld [vmem:[#allocation3 + $0x12] sm:$0x7] }
 0x66c   :  { %994 = vmatpush1.bf16.msra.mxu0 %v1515_v56  ;;  %1374 = vmatpush3.bf16.msra.mxu1 %v1671_v15 }
 0x66d   :  { %995 = vmatprep.subr.bf16.mxu0 %v1516_v57  ;;  %1375 = vmatprep.subr.bf16.mxu1 %v1595_v1 }
 0x670   :  { %996 = vmatpush1.bf16.msra.mxu0 %v1657_v10  ;;  %1376 = vmatpush3.bf16.msra.mxu1 %v1681_v18  ;;  %v878_v10 = vunpack.c.l.bf16 %v877_v2 }
 0x671   :  { %997 = vmatprep.subr.bf16.mxu0 %v1660_v11  ;;  %1377 = vmatprep.subr.bf16.mxu1 %v1595_v1 }
 0x674   :  { %998 = vmatpush1.bf16.msra.mxu0 %v1665_v13  ;;  %1378 = vmatpush3.bf16.msra.mxu1 %v1691_v21  ;;  %v969_v13 = vrot.slane %v878_v10, 2 }
 0x675   :  { %999 = vmatprep.subr.bf16.mxu0 %v1668_v14  ;;  %1379 = vmatprep.subr.bf16.mxu1 %v1595_v1 }
 0x678   :  { %1000 = vmatpush1.bf16.msra.mxu0 %v1674_v16  ;;  %1380 = vmatpush3.bf16.msra.mxu1 %v1701_v24 }
 0x679   :  { %1001 = vmatprep.subr.bf16.mxu0 %v1677_v17  ;;  %1381 = vmatprep.subr.bf16.mxu1 %v1595_v1 }
 0x67c   :  { %1002 = vmatpush1.bf16.msra.mxu0 %v1685_v19  ;;  %1382 = vmatpush3.bf16.msra.mxu1 %v1711_v27 }
 0x67d   :  { %1003 = vmatprep.subr.bf16.mxu0 %v1688_v20  ;;  %1383 = vmatprep.subr.bf16.mxu1 %v1595_v1 }
 0x680   :  { %1004 = vmatpush1.bf16.msra.mxu0 %v1695_v22  ;;  %1384 = vmatpush3.bf16.msra.mxu1 %v1718_v29  ;;  %v979_v29 = vrot.slane %v878_v10, 4 }
 0x681   :  { %1005 = vmatprep.subr.bf16.mxu0 %v1698_v23  ;;  %1385 = vmatprep.subr.bf16.mxu1 %v1595_v1 }
 0x684   :  { %1006 = vmatpush1.bf16.msra.mxu0 %v1705_v25  ;;  %1386 = vmatpush3.bf16.msra.mxu1 %v1725_v30 }
 0x73a   :  { %v914_v11 = vpop.f32.mrb[24].mxu0  ;;  %v955_v12 = vpop.f32.mrb[24].mxu1 }
 0x73b   :  { %v961_v14 = vadd.f32 %v914_v11, %v878_v10  ;;  %v916_v15 = vpop.f32.mrb[25].mxu0  ;;  %v1369_v16 = vpop.f32.mrb[25].mxu1 }
 0x73c   :  { %v918_v17 = vpop.f32.mrb[26].mxu0  ;;  %v958_v18 = vpop.f32.mrb[26].mxu1  ;;  %v971_v22 = vadd.f32 %v969_v13, %v916_v15 }
 0x73d   :  { %v1155_v19 = vmul.f32 -1.442695, %v961_v14  ;;  %v919_v20 = vpop.f32.mrb[27].mxu0  ;;  %v1370_v21 = vpop.f32.mrb[27].mxu1 }
 0x73e   :  { %v1156_v1 = vmul.f32 -1.442695, %v971_v22 }
 0x73f   :  { %1493 = vpow2.f32 %v1155_v19 }
 0x740   :  { %1495 = vpow2.f32 %v1156_v1 }
 0x749   :  { %v1494_v23 = vpop.eup %1493 }
 0x74a   :  { %v965_v24 = vadd.f32 1.0, %v1494_v23  ;;  %v1496_v25 = vpop.eup %1495 }
 0x74b   :  { %v975_v27 = vadd.f32 1.0, %v1496_v25 }
 0x74c   :  { %1497 = vrcp.f32 %v965_v24 }
 0x74d   :  { %1499 = vrcp.f32 %v975_v27 }
 0x756   :  { %v1498_v30 = vpop.eup %1497 }
 0x757   :  { %v978_v58 = vmul.f32 %v1498_v30, %v955_v12  ;;  %v1500_v60 = vpop.eup %1499 }
 0x758   :  { %v983_v61 = vsub.f32 1.0, %v1500_v60  ;;  %v985_v0 = vmul.f32 %v1500_v60, %v1964_v52 }
 0x759   :  { %v981_v59 = vadd.f32 %v979_v29, %v978_v58 }
 0x75b   :  { %1501 = vtanh.f32 %v981_v59 }
 0x765   :  { %v1502_v62 = vpop.eup %1501 }
 0x766   :  { %v984_v63 = vmul.f32 %v1502_v62, %v983_v61 }
 0x768   :  { %v986_v3 = vadd.f32 %v985_v0, %v984_v63 }
 0x76a   :  { %v990_v4 = vpack.c.bf16 %v986_v3, %v986_v3 }
 0x76c   :  { %1024 = vmatmul.mubr.bf16.vlgmr.msra.gmra.mrb[28].mxu0 %v990_v4  ;;  %1388 = vmatmul.mubr.bf16.vlgmr.msra.gmra.mrb[28].mxu1 %v990_v4 }
 0x83f   :  { %v1025_v8 = vpop.f32.mrb[28].mxu0  ;;  %v1066_v9 = vpop.f32.mrb[28].mxu1 }
 0x840   :  { %v1072_v28 = vadd.f32 %v1025_v8, %v989_v7  ;;  %v1027_v31 = vpop.f32.mrb[29].mxu0  ;;  %v1389_v32 = vpop.f32.mrb[29].mxu1 }
 0x841   :  { %v1029_v33 = vpop.f32.mrb[30].mxu0  ;;  %v1069_v34 = vpop.f32.mrb[30].mxu1  ;;  %v1082_v38 = vadd.f32 %v1080_v26, %v1027_v31 }
 0x842   :  { %v1157_v35 = vmul.f32 -1.442695, %v1072_v28  ;;  %v1030_v36 = vpop.f32.mrb[31].mxu0  ;;  %v1390_v37 = vpop.f32.mrb[31].mxu1 }
 0x843   :  { %v1158_v39 = vmul.f32 -1.442695, %v1082_v38 }
 0x844   :  { %1503 = vpow2.f32 %v1157_v35 }
 0x845   :  { %1505 = vpow2.f32 %v1158_v39 }
 0x84e   :  { %v1504_v5 = vpop.eup %1503 }
 0x84f   :  { %v1076_v40 = vadd.f32 1.0, %v1504_v5  ;;  %v1506_v41 = vpop.eup %1505 }
 0x850   :  { %v1086_v42 = vadd.f32 1.0, %v1506_v41 }
 0x851   :  { %1507 = vrcp.f32 %v1076_v40 }
 0x852   :  { %1509 = vrcp.f32 %v1086_v42 }
 0x85b   :  { %v1508_v44 = vpop.eup %1507 }
 0x85c   :  { %v1089_v45 = vmul.f32 %v1508_v44, %v1066_v9  ;;  %v1510_v47 = vpop.eup %1509 }
 0x85d   :  { %v1094_v48 = vsub.f32 1.0, %v1510_v47  ;;  %v1096_v51 = vmul.f32 %v1510_v47, %v986_v3 }
 0x85e   :  { %v1092_v46 = vadd.f32 %v1090_v43, %v1089_v45 }
 0x860   :  { %1511 = vtanh.f32 %v1092_v46 }
 0x86a   :  { %v1512_v49 = vpop.eup %1511 }
 0x86b   :  { %v1095_v50 = vmul.f32 %v1512_v49, %v1094_v48 }
 0x86d   :  { %v1097_v52 = vadd.f32 %v1096_v51, %v1095_v50 }
 0x86f   :  { %1098 = vst [vmem:[#allocation2] sm:$0x3] %v1097_v52  ;;  %1102 = vst [vmem:[#allocation8] sm:$0x3] %v1097_v52 }
 0x870   :  { %1572 = shalt.err (!%p1569_p6)
}
 0x871   :  { %s1573_s12 = scalar_lea.hbm %s2012_s2, 32 }
 0x872   :  { %p1574_p7 = scmp.ne.s32.totalorder %s2012_s2, %s1573_s12  ;;  %p1577_p8 = scmp.lt.u32.totalorder %s1573_s12, %s2012_s2 }
 0x874   :  { %p1579_p9 = pnand %p1577_p8, %p1574_p7 }
 0x876   :  { %1582 = shalt.err (!%p1579_p9)
}
 0x877   :  { %1112 = dma.vmem_to_hbm [thread:$0]  %s1110_s8, 32, %s2012_s2, [#allocation5]  }
 0x878   :  { %1587 = dma.done.wait [#allocation5], 32  }
 0x879   :  { %1588 = vsyncadd [#allocation5], 4294967264 }
 0x87a   :  { %1116 = vsyncpa [#allocation4], 1 }
 0x87b   :  { %1117 = vsyncpa [#allocation7], 1 }
 0x87c   :  { %1118 = vsyncpa [#allocation5], 1 }

</bundles_post_ra>
